<compile_context>
chip_gen: v7x
topology: tpu7x:2x2x1
jax: 0.10.0
libtpu: 0.0.40
codegen_flags: <defaults>
</compile_context>

<pallas_src>
import math

import jax
import jax.numpy as jnp
from jax import lax
from jax.experimental import pallas as pl
from jax.experimental.pallas import tpu as pltpu


# ----------------------------------------------------------------------------
# Pallas kernel: batched per-sample affine warp via bilinear weights + matmul
# ----------------------------------------------------------------------------
def _make_warp_kernel(TB, C, HW, TN):
    def warp_kernel(aff_ref, qc_ref, pc_ref, img_ref, out_ref):
        # aff_ref : SMEM (N*8,) f32, per-sample [a, b, c, d, e, f, 0, 0]
        #           x_src = a*ox + b*oy + c ;  y_src = d*ox + e*oy + f
        # qc_ref  : VMEM (HW, 2) f32  -> columns [iy, ix] (input-pixel coords, rows q)
        # pc_ref  : VMEM (2, TN) f32  -> rows    [oy, ox] (output-pixel coords, cols p)
        # img_ref : VMEM (TB, C, HW) f32
        # out_ref : VMEM (TB, C, TN) f32
        n0 = pl.program_id(0) * TB

        iy = qc_ref[:, 0:1]            # (HW, 1)
        ix = qc_ref[:, 1:2]            # (HW, 1)
        oy = pc_ref[0:1, :]            # (1, TN)
        ox = pc_ref[1:2, :]            # (1, TN)

        def body(t, carry):
            base = (n0 + t) * 8
            a = aff_ref[base + 0]
            b = aff_ref[base + 1]
            c = aff_ref[base + 2]
            d = aff_ref[base + 3]
            e = aff_ref[base + 4]
            f = aff_ref[base + 5]

            sx = a * ox + b * oy + c   # (1, TN) source x for each output pixel
            sy = d * ox + e * oy + f   # (1, TN) source y

            # Fused bilinear weight slab Wt[q, p]; zero padding outside the
            # image falls out naturally (weights clamp to 0).
            wt = (jnp.maximum(0.0, 1.0 - jnp.abs(sy - iy))
                  * jnp.maximum(0.0, 1.0 - jnp.abs(sx - ix)))   # (HW, TN) f32

            img = img_ref[t]                                    # (C, HW)
            out_ref[t] = jnp.dot(img.astype(jnp.bfloat16),
                                 wt.astype(jnp.bfloat16),
                                 preferred_element_type=jnp.float32)
            return carry

        lax.fori_loop(0, TB, body, 0, unroll=True)

    return warp_kernel


def warp_batch(x_flat, aff, H, W):
    """x_flat: (N, C, H*W) f32, aff: (N, 8) f32 -> (N, C, H*W) f32."""
    N, C, HW = x_flat.shape
    assert HW == H * W

    # Output-column tile: keep the (HW, TN) weight slab bounded at large images.
    TN = HW
    if HW > 2048:
        for cand in (2048, 1024, 512, 256, 128):
            if HW % cand == 0:
                TN = cand
                break
    # TODO(synk): for very large images also shrink TB so TB live weight slabs fit VMEM.

    # Batch several samples per grid step to amortize per-step overhead, keeping
    # the per-step footprint modest.
    per_sample = HW * TN * 6 + 2 * C * HW * 4 + 2 * C * TN * 4
    max_tb = max(1, min(8, (24 << 20) // max(per_sample, 1)))
    TB = 1
    for t in range(min(N, max_tb), 0, -1):
        if N % t == 0:
            TB = t
            break

    vmem_est = TB * per_sample + (HW * 2 + 2 * TN) * 4 + (4 << 20)
    vmem_limit = int(min(max(vmem_est, 32 << 20), 48 << 20))

    # Constant coordinate planes (resident across the whole grid).
    ys, xs = jnp.meshgrid(jnp.arange(H, dtype=jnp.float32),
                          jnp.arange(W, dtype=jnp.float32), indexing="ij")
    qcoord = jnp.stack([ys.reshape(-1), xs.reshape(-1)], axis=-1)   # (HW, 2)
    pcoord = jnp.stack([ys.reshape(-1), xs.reshape(-1)], axis=0)    # (2, HW)

    kernel = _make_warp_kernel(TB, C, HW, TN)
    grid_spec = pltpu.PrefetchScalarGridSpec(
        num_scalar_prefetch=1,
        grid=(N // TB, HW // TN),
        in_specs=[
            pl.BlockSpec((HW, 2), lambda n, j, aff_sm: (0, 0)),
            pl.BlockSpec((2, TN), lambda n, j, aff_sm: (0, j)),
            pl.BlockSpec((TB, C, HW), lambda n, j, aff_sm: (n, 0, 0)),
        ],
        out_specs=pl.BlockSpec((TB, C, TN), lambda n, j, aff_sm: (n, 0, j)),
    )
    return pl.pallas_call(
        kernel,
        out_shape=jax.ShapeDtypeStruct((N, C, HW), jnp.float32),
        grid_spec=grid_spec,
        compiler_params=pltpu.CompilerParams(
            dimension_semantics=("parallel", "arbitrary"),
            vmem_limit_bytes=vmem_limit,
        ),
    )(aff.reshape(-1), qcoord, pcoord, x_flat)


# ----------------------------------------------------------------------------
# Plain-JAX glue: random augmentation parameters -> composed sampling affine
# ----------------------------------------------------------------------------
def _blend(flag, m, n_batch):
    """Per-sample select between transform matrix m (N,3,3) and identity."""
    eye = jnp.broadcast_to(jnp.eye(3, dtype=jnp.float32), (n_batch, 3, 3))
    return jnp.where(flag[:, None, None], m, eye)


def random_augmentation_affines(key, N, H, W):
    """Compose (output->input) sampling affines for the Kornia-style pipeline."""
    ks = jax.random.split(key, 9)
    Wf, Hf = float(W), float(H)

    # apply-flags, one per transform, p = 0.5 each
    f_hflip = jax.random.bernoulli(ks[0], 0.5, (N,))
    f_vflip = jax.random.bernoulli(ks[1], 0.5, (N,))
    f_crop = jax.random.bernoulli(ks[2], 0.5, (N,))
    f_trans = jax.random.bernoulli(ks[3], 0.5, (N,))
    f_rot = jax.random.bernoulli(ks[4], 0.5, (N,))

    zeros = jnp.zeros((N,), jnp.float32)
    ones = jnp.ones((N,), jnp.float32)

    def mat(rows):
        return jnp.stack([jnp.stack(r, axis=-1) for r in rows], axis=-2)

    # 1. horizontal flip: x_src = (W-1) - x
    m_h = mat([[-ones, zeros, ones * (Wf - 1.0)],
               [zeros, ones, zeros],
               [zeros, zeros, ones]])
    # 2. vertical flip: y_src = (H-1) - y
    m_v = mat([[ones, zeros, zeros],
               [zeros, -ones, ones * (Hf - 1.0)],
               [zeros, zeros, ones]])
    # 3. resized crop, area scale fixed at 0.7, aspect ratio ~ logU(3/4, 4/3)
    #    TODO(synk): kornia draws integer crop geometry and resizes to (512,512);
    #    continuous crop params and same-size output are used here.
    log_r = jax.random.uniform(ks[5], (N,), jnp.float32,
                               math.log(3.0 / 4.0), math.log(4.0 / 3.0))
    ar = jnp.exp(log_r)
    cw = jnp.clip(jnp.sqrt(0.7 * ar) * Wf, 1.0, Wf)
    ch = jnp.clip(jnp.sqrt(0.7 / ar) * Hf, 1.0, Hf)
    x0 = jax.random.uniform(ks[6], (N,), jnp.float32) * (Wf - cw)
    y0 = jax.random.uniform(ks[7], (N,), jnp.float32) * (Hf - ch)
    m_c = mat([[(cw - 1.0) / (Wf - 1.0), zeros, x0],
               [zeros, (ch - 1.0) / (Hf - 1.0), y0],
               [zeros, zeros, ones]])
    # 4. random translate up to 20% of extent: x_src = x - tx
    txy = jax.random.uniform(ks[8], (N, 2), jnp.float32, -1.0, 1.0)
    tx = txy[:, 0] * 0.2 * Wf
    ty = txy[:, 1] * 0.2 * Hf
    m_t = mat([[ones, zeros, -tx],
               [zeros, ones, -ty],
               [zeros, zeros, ones]])
    # 5. random rotation in [-30, 30] degrees about the image center
    #    TODO(synk): align_corners=True-style pixel-index convention here; Kornia's
    #    warp_affine default uses half-pixel centers (small sub-pixel offset).
    theta = jax.random.uniform(jax.random.fold_in(key, 99), (N,), jnp.float32,
                               -30.0, 30.0) * (math.pi / 180.0)
    cx, cy = (Wf - 1.0) / 2.0, (Hf - 1.0) / 2.0
    cth, sth = jnp.cos(theta), jnp.sin(theta)
    m_r = mat([[cth, sth, cx - cth * cx - sth * cy],
               [-sth, cth, cy + sth * cx - cth * cy],
               [zeros, zeros, ones]])

    m1 = _blend(f_hflip, m_h, N)
    m2 = _blend(f_vflip, m_v, N)
    m3 = _blend(f_crop, m_c, N)
    m4 = _blend(f_trans, m_t, N)
    m5 = _blend(f_rot, m_r, N)

    # sequential application => sampling (inverse) maps compose left-to-right
    m = m1 @ m2 @ m3 @ m4 @ m5  # (N, 3, 3)

    aff = jnp.concatenate([m[:, 0, :], m[:, 1, :],
                           jnp.zeros((N, 2), jnp.float32)], axis=-1)  # (N, 8)
    return aff


def data_augmentation(x, key):
    """Forward pass of DataAugmentation. x: (N, C, H, W) float32 -> same shape."""
    N, C, H, W = x.shape
    aff = random_augmentation_affines(key, N, H, W)
    out_flat = warp_batch(x.reshape(N, C, H * W).astype(jnp.float32), aff, H, W)
    return out_flat.reshape(N, C, H, W)


if __name__ == "__main__":
    key = jax.random.PRNGKey(0)
    k_x, k_aug = jax.random.split(key)
    x = jax.random.normal(k_x, (2, 4, 16, 16), jnp.float32)  # NCHW
    y = data_augmentation(x, k_aug)
    jax.block_until_ready(y)
    assert y.shape == x.shape and y.dtype == jnp.float32
    print("KERNEL_OK")
</pallas_src>

<mosaic_0001>
module attributes {stable_mosaic.version = 11 : i64} {
  func.func @warp_kernel(%arg0: i32, %arg1: i32, %arg2: memref<16xf32, #tpu.memory_space<smem>>, %arg3: memref<256x2xf32, #tpu.memory_space<vmem>>, %arg4: memref<2x256xf32, #tpu.memory_space<vmem>>, %arg5: memref<2x4x256xf32, #tpu.memory_space<vmem>>, %arg6: memref<2x4x256xf32, #tpu.memory_space<vmem>>) attributes {dimension_semantics = [#tpu.dimension_semantics<parallel>, #tpu.dimension_semantics<arbitrary>], iteration_bounds = array<i64: 1, 1>, scalar_prefetch = 1 : i64, scratch_operands = 0 : i64, tpu.core_type = #tpu.core_type<tc>, window_params = [{pipeline_mode = #tpu.pipeline_mode<synchronous>, transform_indices = @transform_0, window_bounds = array<i64: 256, 2>}, {transform_indices = @transform_1, window_bounds = array<i64: 2, 256>}, {transform_indices = @transform_2, window_bounds = array<i64: 2, 4, 256>}, {transform_indices = @transform_3, window_bounds = array<i64: 2, 4, 256>}]} {
    %c2_i32 = arith.constant 2 : i32
    %0 = arith.muli %arg0, %c2_i32 : i32
    %c0 = arith.constant 0 : index
    %c0_0 = arith.constant 0 : index
    %1 = vector.load %arg3[%c0, %c0_0] : memref<256x2xf32, #tpu.memory_space<vmem>>, vector<256x1xf32>
    %c0_1 = arith.constant 0 : index
    %c1 = arith.constant 1 : index
    %2 = vector.load %arg3[%c0_1, %c1] : memref<256x2xf32, #tpu.memory_space<vmem>>, vector<256x1xf32>
    %c0_2 = arith.constant 0 : index
    %c0_3 = arith.constant 0 : index
    %3 = vector.load %arg4[%c0_2, %c0_3] : memref<2x256xf32, #tpu.memory_space<vmem>>, vector<1x256xf32>
    %c1_4 = arith.constant 1 : index
    %c0_5 = arith.constant 0 : index
    %4 = vector.load %arg4[%c1_4, %c0_5] : memref<2x256xf32, #tpu.memory_space<vmem>>, vector<1x256xf32>
    %c0_i32 = arith.constant 0 : i32
    %5 = arith.addi %0, %c0_i32 : i32
    %c8_i32 = arith.constant 8 : i32
    %6 = arith.muli %5, %c8_i32 : i32
    %c0_i32_6 = arith.constant 0 : i32
    %7 = arith.addi %6, %c0_i32_6 : i32
    %8 = arith.index_cast %7 : i32 to index
    %9 = memref.load %arg2[%8] : memref<16xf32, #tpu.memory_space<smem>>
    %c1_i32 = arith.constant 1 : i32
    %10 = arith.addi %6, %c1_i32 : i32
    %11 = arith.index_cast %10 : i32 to index
    %12 = memref.load %arg2[%11] : memref<16xf32, #tpu.memory_space<smem>>
    %c2_i32_7 = arith.constant 2 : i32
    %13 = arith.addi %6, %c2_i32_7 : i32
    %14 = arith.index_cast %13 : i32 to index
    %15 = memref.load %arg2[%14] : memref<16xf32, #tpu.memory_space<smem>>
    %c3_i32 = arith.constant 3 : i32
    %16 = arith.addi %6, %c3_i32 : i32
    %17 = arith.index_cast %16 : i32 to index
    %18 = memref.load %arg2[%17] : memref<16xf32, #tpu.memory_space<smem>>
    %c4_i32 = arith.constant 4 : i32
    %19 = arith.addi %6, %c4_i32 : i32
    %20 = arith.index_cast %19 : i32 to index
    %21 = memref.load %arg2[%20] : memref<16xf32, #tpu.memory_space<smem>>
    %c5_i32 = arith.constant 5 : i32
    %22 = arith.addi %6, %c5_i32 : i32
    %23 = arith.index_cast %22 : i32 to index
    %24 = memref.load %arg2[%23] : memref<16xf32, #tpu.memory_space<smem>>
    %25 = vector.broadcast %9 : f32 to vector<1x256xf32>
    %26 = arith.mulf %25, %4 : vector<1x256xf32>
    %27 = vector.broadcast %12 : f32 to vector<1x256xf32>
    %28 = arith.mulf %27, %3 : vector<1x256xf32>
    %29 = arith.addf %26, %28 : vector<1x256xf32>
    %30 = vector.broadcast %15 : f32 to vector<1x256xf32>
    %31 = arith.addf %29, %30 : vector<1x256xf32>
    %32 = vector.broadcast %18 : f32 to vector<1x256xf32>
    %33 = arith.mulf %32, %4 : vector<1x256xf32>
    %34 = vector.broadcast %21 : f32 to vector<1x256xf32>
    %35 = arith.mulf %34, %3 : vector<1x256xf32>
    %36 = arith.addf %33, %35 : vector<1x256xf32>
    %37 = vector.broadcast %24 : f32 to vector<1x256xf32>
    %38 = arith.addf %36, %37 : vector<1x256xf32>
    %39 = vector.broadcast %38 : vector<1x256xf32> to vector<256x256xf32>
    %40 = vector.broadcast %1 : vector<256x1xf32> to vector<256x256xf32>
    %41 = arith.subf %39, %40 : vector<256x256xf32>
    %42 = math.absf %41 : vector<256x256xf32>
    %cst = arith.constant 1.000000e+00 : f32
    %43 = vector.broadcast %cst : f32 to vector<256x256xf32>
    %44 = arith.subf %43, %42 : vector<256x256xf32>
    %cst_8 = arith.constant 0.000000e+00 : f32
    %45 = vector.broadcast %cst_8 : f32 to vector<256x256xf32>
    %46 = arith.maximumf %45, %44 : vector<256x256xf32>
    %47 = vector.broadcast %31 : vector<1x256xf32> to vector<256x256xf32>
    %48 = vector.broadcast %2 : vector<256x1xf32> to vector<256x256xf32>
    %49 = arith.subf %47, %48 : vector<256x256xf32>
    %50 = math.absf %49 : vector<256x256xf32>
    %cst_9 = arith.constant 1.000000e+00 : f32
    %51 = vector.broadcast %cst_9 : f32 to vector<256x256xf32>
    %52 = arith.subf %51, %50 : vector<256x256xf32>
    %cst_10 = arith.constant 0.000000e+00 : f32
    %53 = vector.broadcast %cst_10 : f32 to vector<256x256xf32>
    %54 = arith.maximumf %53, %52 : vector<256x256xf32>
    %55 = arith.mulf %46, %54 : vector<256x256xf32>
    %56 = arith.index_cast %c0_i32 : i32 to index
    %c0_11 = arith.constant 0 : index
    %c0_12 = arith.constant 0 : index
    %57 = vector.load %arg5[%56, %c0_11, %c0_12] : memref<2x4x256xf32, #tpu.memory_space<vmem>>, vector<1x4x256xf32>
    %58 = vector.shape_cast %57 : vector<1x4x256xf32> to vector<4x256xf32>
    %59 = arith.truncf %58 : vector<4x256xf32> to vector<4x256xbf16>
    %60 = arith.truncf %55 : vector<256x256xf32> to vector<256x256xbf16>
    %cst_13 = arith.constant dense<0.000000e+00> : vector<4x256xf32>
    %61 = tpu.matmul %59, %60, %cst_13 {dimension_numbers = #tpu.dot_dimension_numbers<[1], [0], [0], [1], [0, 0, 1, 1], [], []>} : vector<4x256xbf16>, vector<256x256xbf16>, vector<4x256xf32> -> vector<4x256xf32>
    %62 = arith.index_cast %c0_i32 : i32 to index
    %c0_14 = arith.constant 0 : index
    %c0_15 = arith.constant 0 : index
    %63 = vector.load %arg6[%62, %c0_14, %c0_15] : memref<2x4x256xf32, #tpu.memory_space<vmem>>, vector<1x4x256xf32>
    %64 = vector.shape_cast %63 : vector<1x4x256xf32> to vector<4x256xf32>
    %65 = vector.shape_cast %61 : vector<4x256xf32> to vector<1x4x256xf32>
    tpu.vector_store %arg6[%62, %c0_14, %c0_15], %65 {strides = array<i32>} : memref<2x4x256xf32, #tpu.memory_space<vmem>>, vector<1x4x256xf32>,
    %c1_i32_16 = arith.constant 1 : i32
    %66 = arith.addi %0, %c1_i32_16 : i32
    %c8_i32_17 = arith.constant 8 : i32
    %67 = arith.muli %66, %c8_i32_17 : i32
    %c0_i32_18 = arith.constant 0 : i32
    %68 = arith.addi %67, %c0_i32_18 : i32
    %69 = arith.index_cast %68 : i32 to index
    %70 = memref.load %arg2[%69] : memref<16xf32, #tpu.memory_space<smem>>
    %c1_i32_19 = arith.constant 1 : i32
    %71 = arith.addi %67, %c1_i32_19 : i32
    %72 = arith.index_cast %71 : i32 to index
    %73 = memref.load %arg2[%72] : memref<16xf32, #tpu.memory_space<smem>>
    %c2_i32_20 = arith.constant 2 : i32
    %74 = arith.addi %67, %c2_i32_20 : i32
    %75 = arith.index_cast %74 : i32 to index
    %76 = memref.load %arg2[%75] : memref<16xf32, #tpu.memory_space<smem>>
    %c3_i32_21 = arith.constant 3 : i32
    %77 = arith.addi %67, %c3_i32_21 : i32
    %78 = arith.index_cast %77 : i32 to index
    %79 = memref.load %arg2[%78] : memref<16xf32, #tpu.memory_space<smem>>
    %c4_i32_22 = arith.constant 4 : i32
    %80 = arith.addi %67, %c4_i32_22 : i32
    %81 = arith.index_cast %80 : i32 to index
    %82 = memref.load %arg2[%81] : memref<16xf32, #tpu.memory_space<smem>>
    %c5_i32_23 = arith.constant 5 : i32
    %83 = arith.addi %67, %c5_i32_23 : i32
    %84 = arith.index_cast %83 : i32 to index
    %85 = memref.load %arg2[%84] : memref<16xf32, #tpu.memory_space<smem>>
    %86 = vector.broadcast %70 : f32 to vector<1x256xf32>
    %87 = arith.mulf %86, %4 : vector<1x256xf32>
    %88 = vector.broadcast %73 : f32 to vector<1x256xf32>
    %89 = arith.mulf %88, %3 : vector<1x256xf32>
    %90 = arith.addf %87, %89 : vector<1x256xf32>
    %91 = vector.broadcast %76 : f32 to vector<1x256xf32>
    %92 = arith.addf %90, %91 : vector<1x256xf32>
    %93 = vector.broadcast %79 : f32 to vector<1x256xf32>
    %94 = arith.mulf %93, %4 : vector<1x256xf32>
    %95 = vector.broadcast %82 : f32 to vector<1x256xf32>
    %96 = arith.mulf %95, %3 : vector<1x256xf32>
    %97 = arith.addf %94, %96 : vector<1x256xf32>
    %98 = vector.broadcast %85 : f32 to vector<1x256xf32>
    %99 = arith.addf %97, %98 : vector<1x256xf32>
    %100 = vector.broadcast %99 : vector<1x256xf32> to vector<256x256xf32>
    %101 = vector.broadcast %1 : vector<256x1xf32> to vector<256x256xf32>
    %102 = arith.subf %100, %101 : vector<256x256xf32>
    %103 = math.absf %102 : vector<256x256xf32>
    %cst_24 = arith.constant 1.000000e+00 : f32
    %104 = vector.broadcast %cst_24 : f32 to vector<256x256xf32>
    %105 = arith.subf %104, %103 : vector<256x256xf32>
    %cst_25 = arith.constant 0.000000e+00 : f32
    %106 = vector.broadcast %cst_25 : f32 to vector<256x256xf32>
    %107 = arith.maximumf %106, %105 : vector<256x256xf32>
    %108 = vector.broadcast %92 : vector<1x256xf32> to vector<256x256xf32>
    %109 = vector.broadcast %2 : vector<256x1xf32> to vector<256x256xf32>
    %110 = arith.subf %108, %109 : vector<256x256xf32>
    %111 = math.absf %110 : vector<256x256xf32>
    %cst_26 = arith.constant 1.000000e+00 : f32
    %112 = vector.broadcast %cst_26 : f32 to vector<256x256xf32>
    %113 = arith.subf %112, %111 : vector<256x256xf32>
    %cst_27 = arith.constant 0.000000e+00 : f32
    %114 = vector.broadcast %cst_27 : f32 to vector<256x256xf32>
    %115 = arith.maximumf %114, %113 : vector<256x256xf32>
    %116 = arith.mulf %107, %115 : vector<256x256xf32>
    %117 = arith.index_cast %c1_i32_16 : i32 to index
    %c0_28 = arith.constant 0 : index
    %c0_29 = arith.constant 0 : index
    %118 = vector.load %arg5[%117, %c0_28, %c0_29] : memref<2x4x256xf32, #tpu.memory_space<vmem>>, vector<1x4x256xf32>
    %119 = vector.shape_cast %118 : vector<1x4x256xf32> to vector<4x256xf32>
    %120 = arith.truncf %119 : vector<4x256xf32> to vector<4x256xbf16>
    %121 = arith.truncf %116 : vector<256x256xf32> to vector<256x256xbf16>
    %cst_30 = arith.constant dense<0.000000e+00> : vector<4x256xf32>
    %122 = tpu.matmul %120, %121, %cst_30 {dimension_numbers = #tpu.dot_dimension_numbers<[1], [0], [0], [1], [0, 0, 1, 1], [], []>} : vector<4x256xbf16>, vector<256x256xbf16>, vector<4x256xf32> -> vector<4x256xf32>
    %123 = arith.index_cast %c1_i32_16 : i32 to index
    %c0_31 = arith.constant 0 : index
    %c0_32 = arith.constant 0 : index
    %124 = vector.load %arg6[%123, %c0_31, %c0_32] : memref<2x4x256xf32, #tpu.memory_space<vmem>>, vector<1x4x256xf32>
    %125 = vector.shape_cast %124 : vector<1x4x256xf32> to vector<4x256xf32>
    %126 = vector.shape_cast %122 : vector<4x256xf32> to vector<1x4x256xf32>
    tpu.vector_store %arg6[%123, %c0_31, %c0_32], %126 {strides = array<i32>} : memref<2x4x256xf32, #tpu.memory_space<vmem>>, vector<1x4x256xf32>,
    %c2_i32_33 = arith.constant 2 : i32
    return
  }
  func.func @transform_0(%arg0: i32, %arg1: i32, %arg2: memref<16xf32, #tpu.memory_space<smem>>) -> (i32, i32) {
    %c0_i32 = arith.constant 0 : i32
    %c0_i32_0 = arith.constant 0 : i32
    %c0_i32_1 = arith.constant 0 : i32
    return %c0_i32, %c0_i32_0 : i32, i32
  }
  func.func @transform_1(%arg0: i32, %arg1: i32, %arg2: memref<16xf32, #tpu.memory_space<smem>>) -> (i32, i32) {
    %c0_i32 = arith.constant 0 : i32
    %c0_i32_0 = arith.constant 0 : i32
    return %c0_i32, %arg1 : i32, i32
  }
  func.func @transform_2(%arg0: i32, %arg1: i32, %arg2: memref<16xf32, #tpu.memory_space<smem>>) -> (i32, i32, i32) {
    %c0_i32 = arith.constant 0 : i32
    %c0_i32_0 = arith.constant 0 : i32
    %c0_i32_1 = arith.constant 0 : i32
    return %arg0, %c0_i32, %c0_i32_0 : i32, i32, i32
  }
  func.func @transform_3(%arg0: i32, %arg1: i32, %arg2: memref<16xf32, #tpu.memory_space<smem>>) -> (i32, i32, i32) {
    %c0_i32 = arith.constant 0 : i32
    %c0_i32_0 = arith.constant 0 : i32
    return %arg0, %c0_i32, %arg1 : i32, i32, i32
  }
}

</mosaic_0001>

<bundles_post_ra>
// kernel: tpu_custom_call.1
= control target key start
LH: loop header
LB: loop body
LE: loop exit
PB: predicated region body
PF: predicated region fallthrough
CT: control target
= control target key end

     0   :  { %s3059_s0 = inlined_call_operand.vmem [shape: f32[16], index: 0, kind: input, shape index: {}]   ;;  %s3060_s1 = inlined_call_operand.vmem [shape: f32[256,2], index: 1, kind: input, shape index: {}]   ;;  %s3061_s2 = inlined_call_operand.vmem [shape: f32[2,256], index: 2, kind: input, shape index: {}]   ;;  %s3062_s3 = inlined_call_operand.vmem [shape: f32[2,4,256], index: 3, kind: input, shape index: {}]   ;;  %s3063_s4 = inlined_call_operand.hbm [shape: f32[2,4,256], index: 4, kind: output, shape index: {}]  }
   0x1   :  { %s9_s17 = sshll.u32 %s3059_s0, 4  ;;  %s10_s17 = int_to_ptr.vmem [resolvable:$true] %s9_s17 }
   0x2   :  { %s1836_s18 = scalar_lea.vmem %s10_s17, 16  ;;  %p1841_p1 = scmp.lt.s32.totalorder %s10_s17, %s10_s17 }
   0x3   :  { %p1837_p0 = scmp.ne.s32.totalorder %s10_s17, %s1836_s18  ;;  %p1842_p2 = scmp.lt.s32.totalorder %s1836_s18, %s1836_s18 }
   0x5   :  { %p1843_p3 = por %p1842_p2, %p1841_p1 }
   0x7   :  { %p1844_p4 = pnand %p1843_p3, %p1837_p0 }
   0x9   :  { %1847 = shalt.err (!%p1844_p4)  }
   0xa   :  { %s1874_s19 = smov [#allocation3]  }
   0xb   :  { %12 = dma.vmem_to_smem %s10_s17, 16, %s1874_s19, [#allocation2] }
   0xc   :  { %1870 = dma.done.wait [#allocation2], 16 }
   0xd   :  { %1871 = vsyncadd [#allocation2], 4294967280 }
   0xe   :  { %14 = sfence }
   0xf   :  { %v25_v0 = vld [vmem:[%s3060_s1 + $0x10] sm:$0xff]  ;;  %v23_v1 = vld [vmem:[%s3060_s1] sm:$0xff]  ;;  %v3064_v2 = vmov 1   ;;  %v24_v4 = vld [vmem:[%s3060_s1 + $0x8] sm:$0xff]  ;;  %v3066_v7 = vmov 0  }
  0x10   :  { %1802 = vset.pattern.permute.xlu0 %v3064_v2  ;;  %1800 = vset.pattern.permute.xlu1 %v3064_v2  ;;  %v29_v3 = vld [vmem:[%s3060_s1 + $0x30] sm:$0xff]  ;;  %v26_v6 = vld [vmem:[%s3060_s1 + $0x18] sm:$0xff] }
  0x11   :  { %531 = vperm.xlu0 %1802, %v25_v0   ;;  %523 = vperm.xlu1 %1800, %v23_v1   ;;  %v33_v5 = vld [vmem:[%s3060_s1 + $0x50] sm:$0xff] }
  0x12   :  { %v37_v8 = vld [vmem:[%s3060_s1 + $0x70] sm:$0xff] }
  0x15   :  { %547 = vperm.xlu0 %1802, %v29_v3   ;;  %527 = vperm.xlu1 %1800, %v24_v4  }
  0x19   :  { %563 = vperm.xlu0 %1802, %v33_v5   ;;  %1801 = vset.pattern.permute.xlu1 %v3066_v7 }
  0x1a   :  { %112 = vperm.xlu1 %1801, %v26_v6  }
  0x1b   :  { %15 = vsyncpa [#allocation5], 0  ;;  %v41_v9 = vld [vmem:[%s3060_s1 + $0x90] sm:$0xff]  ;;  %v27_v10 = vld [vmem:[%s3060_s1 + $0x20] sm:$0xff]  ;;  %s59_s16 = sld [smem:[#allocation3]]  ;;  %s1782_s17 = sld [smem:[#allocation3 + $0x1]]  ;;  %v85_v34 = vlaneseq }
  0x1c   :  { %v45_v11 = vld [vmem:[%s3060_s1 + $0xb0] sm:$0xff]  ;;  %v28_v13 = vld [vmem:[%s3060_s1 + $0x28] sm:$0xff]  ;;  %v30_v14 = vld [vmem:[%s3060_s1 + $0x38] sm:$0xff]  ;;  %s1787_s20 = sld [smem:[#allocation3 + $0x8]]  ;;  %s1788_s21 = sld [smem:[#allocation3 + $0x9]] }
  0x1d   :  { %579 = vperm.xlu0 %1802, %v37_v8   ;;  %v49_v12 = vld [vmem:[%s3060_s1 + $0xd0] sm:$0xff]  ;;  %v31_v15 = vld [vmem:[%s3060_s1 + $0x40] sm:$0xff]  ;;  %v32_v16 = vld [vmem:[%s3060_s1 + $0x48] sm:$0xff]  ;;  %s1784_s22 = sld [smem:[#allocation3 + $0x3]]  ;;  %s1785_s23 = sld [smem:[#allocation3 + $0x4]]  ;;  %v86_v47 = vshrl.u32 %v85_v34, 7 }
  0x1e   :  { %1803 = vset.pattern.permute.xlu1 %v3064_v2  ;;  %v36_v17 = vld [vmem:[%s3060_s1 + $0x68] sm:$0xff]  ;;  %v34_v18 = vld [vmem:[%s3060_s1 + $0x58] sm:$0xff]  ;;  %v35_v20 = vld [vmem:[%s3060_s1 + $0x60] sm:$0xff]  ;;  %s2016_s0 = sld [smem:[#allocation3 + $0xb]]  ;;  %s2018_s24 = sld [smem:[#allocation3 + $0xc]] }
  0x1f   :  { %535 = vperm.xlu1 %1803, %v26_v6   ;;  %v40_v19 = vld [vmem:[%s3060_s1 + $0x88] sm:$0xff]  ;;  %v38_v23 = vld [vmem:[%s3060_s1 + $0x78] sm:$0xff]  ;;  %v39_v25 = vld [vmem:[%s3060_s1 + $0x80] sm:$0xff]  ;;  %s2020_s25 = sld [smem:[#allocation3 + $0x2]]  ;;  %s1786_s7 = sld [smem:[#allocation3 + $0x5]]  ;;  %v87_v55 = vsub.s32 0, %v86_v47 }
  0x20   :  { %v1982_v21 = vld [vmem:[%s3060_s1 + $0xa8] sm:$0xff]  ;;  %v53_v26 = vld [vmem:[%s3060_s1 + $0xf0] sm:$0xff]  ;;  %v42_v27 = vld [vmem:[%s3060_s1 + $0x98] sm:$0xff]  ;;  %s2029_s30 = sld [smem:[#allocation3 + $0xa]]  ;;  %v91_v59 = vsub.s32 1, %v86_v47 }
  0x21   :  { %595 = vperm.xlu0 %1802, %v41_v9   ;;  %v1989_v22 = vld [vmem:[%s3060_s1 + $0xc8] sm:$0xff]  ;;  %v55_v28 = vld [vmem:[%s3061_s2] ss:$2 sm:$0x3]  ;;  %v70_v30 = vstv %s59_s16  ;;  %v72_v31 = vstv %s1782_s17 }
  0x22   :  { %v2000_v24 = vld [vmem:[%s3060_s1 + $0xe8] sm:$0xff]  ;;  %v1781_v29 = vld [vmem:[%s3061_s2 + $0x1] ss:$2 sm:$0x3]  ;;  %v1067_v32 = vstv %s1787_s20  ;;  %v1069_v33 = vstv %s1788_s21  ;;  %v73_v37 = vmul.f32 %v72_v31, %v55_v28  ;;  %s1792_s2 = sld [smem:[#allocation3 + $0xd]] }
  0x23   :  { %1804 = vset.pattern.permute.xlu1 %v3066_v7  ;;  %v43_v35 = vld [vmem:[%s3060_s1 + $0xa0] sm:$0xff]  ;;  %v71_v36 = vmul.f32 %v1781_v29, %v70_v30  ;;  %v77_v38 = vstv %s1784_s22  ;;  %v79_v39 = vstv %s1785_s23  ;;  %v1068_v40 = vmul.f32 %v1781_v29, %v1067_v32 }
  0x24   :  { %117 = vperm.xlu1 %1804, %v27_v10   ;;  %v1070_v41 = vmul.f32 %v1069_v33, %v55_v28  ;;  %v1074_v42 = vstv %s2016_s0  ;;  %v1076_v43 = vstv %s2018_s24  ;;  %v78_v44 = vmul.f32 %v1781_v29, %v77_v38 }
  0x25   :  { %611 = vperm.xlu0 %1802, %v45_v11   ;;  %v80_v45 = vmul.f32 %v79_v39, %v55_v28  ;;  %v74_v46 = vadd.f32 %v73_v37, %v71_v36  ;;  %v75_v48 = vstv %s2020_s25  ;;  %v1075_v50 = vmul.f32 %v1781_v29, %v1074_v42 }
  0x26   :  { %v1071_v49 = vadd.f32 %v1070_v41, %v1068_v40  ;;  %v1077_v51 = vmul.f32 %v1076_v43, %v55_v28  ;;  %v1072_v52 = vstv %s2029_s30  ;;  %v82_v56 = vstv %s1786_s7 }
  0x27   :  { %v81_v53 = vadd.f32 %v80_v45, %v78_v44  ;;  %v76_v54 = vadd.f32 %v75_v48, %v74_v46 }
  0x28   :  { %1805 = vset.pattern.permute.xlu1 %v3064_v2  ;;  %v1073_v57 = vadd.f32 %v1072_v52, %v1071_v49  ;;  %v1078_v58 = vadd.f32 %v1077_v51, %v1075_v50  ;;  %v1079_v60 = vstv %s1792_s2  ;;  %v47_v51 = vld [vmem:[%s3060_s1 + $0xc0] sm:$0xff] }
  0x29   :  { %627 = vperm.xlu0 %1802, %v49_v12   ;;  %539 = vperm.xlu1 %1805, %v27_v10   ;;  %v83_v61 = vadd.f32 %v82_v56, %v81_v53  ;;  %v2041_v62 = vrot.slane %v76_v54, %v87_v55 }
  0x2a   :  { %v2043_v63 = vrot.slane %v1073_v57, %v87_v55 }
  0x2d   :  { %1827 = vset.pattern.permute.xlu0 %v3066_v7  ;;  %543 = vperm.xlu1 %1805, %v28_v13  }
  0x2e   :  { %97 = vperm.xlu0 %1827, %v23_v1   ;;  %v2045_v1 = vrot.slane %v76_v54, %v91_v59 }
  0x31   :  { %1806 = vset.pattern.permute.xlu1 %v3066_v7 }
  0x32   :  { %102 = vperm.xlu0 %1827, %v24_v4   ;;  %132 = vperm.xlu1 %1806, %v30_v14  }
  0x36   :  { %107 = vperm.xlu0 %1827, %v25_v0   ;;  %1807 = vset.pattern.permute.xlu1 %v3064_v2  ;;  %v1080_v0 = vadd.f32 %v1079_v60, %v1078_v58 }
  0x37   :  { %551 = vperm.xlu1 %1807, %v30_v14  }
  0x3a   :  { %122 = vperm.xlu0 %1827, %v28_v13  }
  0x3b   :  { %1808 = vset.pattern.permute.xlu1 %v3066_v7 }
  0x3c   :  { %137 = vperm.xlu1 %1808, %v31_v15  }
  0x3e   :  { %127 = vperm.xlu0 %1827, %v29_v3   ;;  %v46_v3 = vld [vmem:[%s3060_s1 + $0xb8] sm:$0xff] }
  0x40   :  { %1809 = vset.pattern.permute.xlu1 %v3064_v2 }
  0x41   :  { %555 = vperm.xlu1 %1809, %v31_v15  }
  0x42   :  { %142 = vperm.xlu0 %1827, %v32_v16  }
  0x45   :  { %559 = vperm.xlu1 %1809, %v32_v16   ;;  %v2067_v16 = vrot.slane %v1080_v0, %v87_v55 }
  0x46   :  { %147 = vperm.xlu0 %1827, %v33_v5   ;;  %v2052_v5 = vrot.slane %v1073_v57, %v91_v59 }
  0x49   :  { %1810 = vset.pattern.permute.xlu1 %v3066_v7 }
  0x4a   :  { %162 = vperm.xlu0 %1827, %v36_v17   ;;  %152 = vperm.xlu1 %1810, %v34_v18  }
  0x4e   :  { %167 = vperm.xlu0 %1827, %v37_v8   ;;  %1811 = vset.pattern.permute.xlu1 %v3064_v2  ;;  %v2054_v8 = vrot.slane %v83_v61, %v87_v55 }
  0x4f   :  { %567 = vperm.xlu1 %1811, %v34_v18  }
  0x52   :  { %182 = vperm.xlu0 %1827, %v40_v19  }
  0x53   :  { %1812 = vset.pattern.permute.xlu1 %v3066_v7 }
  0x54   :  { %157 = vperm.xlu1 %1812, %v35_v20  }
  0x56   :  { %187 = vperm.xlu0 %1827, %v41_v9  }
  0x58   :  { %1813 = vset.pattern.permute.xlu1 %v3064_v2 }
  0x59   :  { %571 = vperm.xlu1 %1813, %v35_v20  }
  0x5a   :  { %202 = vperm.xlu0 %1827, %v1982_v21  }
  0x5d   :  { %575 = vperm.xlu1 %1813, %v36_v17  }
  0x5e   :  { %207 = vperm.xlu0 %1827, %v45_v11  }
  0x61   :  { %1814 = vset.pattern.permute.xlu1 %v3066_v7 }
  0x62   :  { %222 = vperm.xlu0 %1827, %v1989_v22   ;;  %172 = vperm.xlu1 %1814, %v38_v23  }
  0x66   :  { %227 = vperm.xlu0 %1827, %v49_v12   ;;  %1815 = vset.pattern.permute.xlu1 %v3064_v2  ;;  %v2061_v12 = vrot.slane %v83_v61, %v91_v59 }
  0x67   :  { %583 = vperm.xlu1 %1815, %v38_v23  }
  0x6a   :  { %242 = vperm.xlu0 %1827, %v2000_v24  }
  0x6b   :  { %1816 = vset.pattern.permute.xlu1 %v3066_v7 }
  0x6c   :  { %177 = vperm.xlu1 %1816, %v39_v25  }
  0x6e   :  { %247 = vperm.xlu0 %1827, %v53_v26  }
  0x70   :  { %1817 = vset.pattern.permute.xlu1 %v3064_v2 }
  0x71   :  { %587 = vperm.xlu1 %1817, %v39_v25  }
  0x72   :  { %1832 = vset.pattern.permute.xlu0 %v3064_v2 }
  0x73   :  { %643 = vperm.xlu0 %1832, %v53_v26  }
  0x75   :  { %591 = vperm.xlu1 %1817, %v40_v19   ;;  %v2071_v19 = vrot.slane %v1080_v0, %v91_v59 }
  0x79   :  { %1818 = vset.pattern.permute.xlu1 %v3066_v7 }
  0x7a   :  { %192 = vperm.xlu1 %1818, %v42_v27  }
  0x7e   :  { %1819 = vset.pattern.permute.xlu1 %v3064_v2 }
  0x7f   :  { %599 = vperm.xlu1 %1819, %v42_v27  }
  0x83   :  { %1820 = vset.pattern.permute.xlu1 %v3066_v7 }
  0x84   :  { %197 = vperm.xlu1 %1820, %v43_v35  }
  0x88   :  { %1821 = vset.pattern.permute.xlu1 %v3064_v2 }
  0x89   :  { %603 = vperm.xlu1 %1821, %v43_v35  }
  0x8d   :  { %607 = vperm.xlu1 %1821, %v1982_v21  }
  0x90   :  { %v2050_v4 = vpop.permute.xlu1 %523  ;;  %v532_v6 = vpop.permute.xlu0 %531 }
  0x91   :  { %v650_v9 = vsub.f32 %v2041_v62, %v2050_v4  ;;  %v654_v10 = vsub.f32 %v2041_v62, %v532_v6  ;;  %v655_v11 = vsub.f32 %v2045_v1, %v532_v6  ;;  %1822 = vset.pattern.permute.xlu1 %v3066_v7  ;;  %v1359_v13 = vsub.f32 %v2043_v63, %v2050_v4 }
  0x92   :  { %v1363_v14 = vsub.f32 %v2043_v63, %v532_v6  ;;  %v1364_v15 = vsub.f32 %v2052_v5, %v532_v6  ;;  %212 = vperm.xlu1 %1822, %v46_v3  }
  0x93   :  { %v2069_v17 = vand.u32 2147483647, %v650_v9  ;;  %v718_v18 = vand.u32 2147483647, %v654_v10  ;;  %v719_v21 = vand.u32 2147483647, %v655_v11 }
  0x94   :  { %v1427_v23 = vand.u32 2147483647, %v1363_v14  ;;  %v1428_v25 = vand.u32 2147483647, %v1364_v15  ;;  %v2075_v26 = vpop.permute.xlu1 %527  ;;  %v548_v27 = vpop.permute.xlu0 %547  ;;  %v2084_v33 = vand.u32 2147483647, %v1359_v13 }
  0x95   :  { %v782_v29 = vsub.f32 1.0, %v718_v18  ;;  %v652_v30 = vsub.f32 %v2041_v62, %v2075_v26  ;;  %v1361_v31 = vsub.f32 %v2043_v63, %v2075_v26  ;;  %v662_v32 = vsub.f32 %v2041_v62, %v548_v27 }
  0x96   :  { %v783_v34 = vsub.f32 1.0, %v719_v21  ;;  %v1491_v35 = vsub.f32 1.0, %v1427_v23  ;;  %v663_v36 = vsub.f32 %v2045_v1, %v548_v27  ;;  %1823 = vset.pattern.permute.xlu1 %v3064_v2  ;;  %v1492_v38 = vsub.f32 1.0, %v1428_v25 }
  0x97   :  { %v2088_v37 = vmax.f32 %v782_v29, 0.0  ;;  %v2090_v39 = vand.u32 2147483647, %v652_v30  ;;  %v1371_v40 = vsub.f32 %v2043_v63, %v548_v27  ;;  %615 = vperm.xlu1 %1823, %v46_v3   ;;  %v2097_v43 = vand.u32 2147483647, %v1361_v31 }
  0x98   :  { %v2093_v41 = vmax.f32 %v783_v34, 0.0  ;;  %v2095_v42 = vmax.f32 %v1491_v35, 0.0  ;;  %v726_v44 = vand.u32 2147483647, %v662_v32  ;;  %v564_v45 = vpop.permute.xlu0 %563  ;;  %v727_v46 = vand.u32 2147483647, %v663_v36 }
  0x99   :  { %v1372_v47 = vsub.f32 %v2052_v5, %v548_v27  ;;  %v1435_v48 = vand.u32 2147483647, %v1371_v40  ;;  %v670_v49 = vsub.f32 %v2041_v62, %v564_v45  ;;  %v113_v50 = vpop.permute.xlu1 %112  ;;  %v671_v53 = vsub.f32 %v2045_v1, %v564_v45 }
  0x9a   :  { %v790_v52 = vsub.f32 1.0, %v726_v44  ;;  %v1379_v54 = vsub.f32 %v2043_v63, %v564_v45  ;;  %v1380_v55 = vsub.f32 %v2052_v5, %v564_v45  ;;  %v791_v56 = vsub.f32 1.0, %v727_v46 }
  0x9b   :  { %v1436_v57 = vand.u32 2147483647, %v1372_v47  ;;  %v1499_v58 = vsub.f32 1.0, %v1435_v48  ;;  %v734_v59 = vand.u32 2147483647, %v670_v49  ;;  %1824 = vset.pattern.permute.xlu1 %v3066_v7  ;;  %v2108_v60 = vmax.f32 %v1492_v38, 0.0 }
  0x9c   :  { %v735_v61 = vand.u32 2147483647, %v671_v53  ;;  %v1443_v0 = vand.u32 2147483647, %v1379_v54  ;;  %v261_v3 = vsub.f32 %v2054_v8, %v113_v50  ;;  %217 = vperm.xlu1 %1824, %v47_v51   ;;  %v2111_v6 = vmax.f32 %v790_v52, 0.0  ;;  %v580_v29 = vpop.permute.xlu0 %579 }
  0x9d   :  { %v2113_v9 = vmax.f32 %v791_v56, 0.0  ;;  %v1500_v10 = vsub.f32 1.0, %v1436_v57  ;;  %v798_v11 = vsub.f32 1.0, %v734_v59  ;;  %v1444_v14 = vand.u32 2147483647, %v1380_v55 }
  0x9e   :  { %3067 = vst [vmem:[#allocation8_spill] sm:$0xff] %v2111_v6  ;;  %v799_v13 = vsub.f32 1.0, %v735_v61  ;;  %v1507_v15 = vsub.f32 1.0, %v1443_v0  ;;  %v262_v18 = vsub.f32 %v2061_v12, %v113_v50  ;;  %v2116_v21 = vmax.f32 %v1499_v58, 0.0  ;;  %v536_v48 = vpop.permute.xlu1 %535 }
  0x9f   :  { %3068 = vst [vmem:[#allocation9_spill] sm:$0xff] %v2113_v9  ;;  %v2118_v23 = vmax.f32 %v1500_v10, 0.0  ;;  %v325_v25 = vand.u32 2147483647, %v261_v3  ;;  %v1098_v27 = vsub.f32 %v2067_v16, %v113_v50  ;;  %v2121_v30 = vmax.f32 %v798_v11, 0.0 }
  0xa0   :  { %3069 = vst [vmem:[#allocation10_spill] sm:$0xff] %v2116_v21  ;;  %v2123_v31 = vmax.f32 %v799_v13, 0.0  ;;  %v1508_v32 = vsub.f32 1.0, %v1444_v14  ;;  %v326_v34 = vand.u32 2147483647, %v262_v18  ;;  %1825 = vset.pattern.permute.xlu1 %v3064_v2  ;;  %v1099_v36 = vsub.f32 %v2071_v19, %v113_v50  ;;  %v596_v0 = vpop.permute.xlu0 %595 }
  0xa1   :  { %3070 = vst [vmem:[#allocation11_spill] sm:$0xff] %v2118_v23  ;;  %3071 = vst [vmem:[#allocation12_spill] sm:$0xff] %v2121_v30  ;;  %v389_v35 = vsub.f32 1.0, %v325_v25  ;;  %v1162_v38 = vand.u32 2147483647, %v1098_v27  ;;  %v678_v40 = vsub.f32 %v2041_v62, %v580_v29  ;;  %619 = vperm.xlu1 %1825, %v47_v51   ;;  %v2128_v44 = vmax.f32 %v1507_v15, 0.0 }
  0xa2   :  { %3072 = vst [vmem:[#allocation13_spill] sm:$0xff] %v2123_v31  ;;  %v390_v45 = vsub.f32 1.0, %v326_v34  ;;  %v679_v46 = vsub.f32 %v2045_v1, %v580_v29  ;;  %v1387_v47 = vsub.f32 %v2043_v63, %v580_v29  ;;  %v2132_v49 = vmax.f32 %v1508_v32, 0.0  ;;  %v50_v27 = vld [vmem:[%s3060_s1 + $0xd8] sm:$0xff] }
  0xa3   :  { %3073 = vst [vmem:[#allocation14_spill] sm:$0xff] %v2128_v44  ;;  %v1163_v52 = vand.u32 2147483647, %v1099_v36  ;;  %v1226_v53 = vsub.f32 1.0, %v1162_v38  ;;  %v742_v54 = vand.u32 2147483647, %v678_v40  ;;  %v1388_v56 = vsub.f32 %v2052_v5, %v580_v29 }
  0xa4   :  { %3074 = vst [vmem:[#allocation15_spill] sm:$0xff] %v2132_v49  ;;  %v2134_v55 = vmax.f32 %v389_v35, 0.0  ;;  %v743_v50 = vand.u32 2147483647, %v679_v46  ;;  %v1451_v57 = vand.u32 2147483647, %v1387_v47  ;;  %v656_v61 = vsub.f32 %v2041_v62, %v536_v48 }
  0xa5   :  { %v2137_v51 = vmax.f32 %v390_v45, 0.0  ;;  %v1227_v58 = vsub.f32 1.0, %v1163_v52  ;;  %v806_v59 = vsub.f32 1.0, %v742_v54  ;;  %623 = vperm.xlu1 %1825, %v1989_v22   ;;  %v1452_v10 = vand.u32 2147483647, %v1388_v56 }
  0xa6   :  { %v807_v3 = vsub.f32 1.0, %v743_v50  ;;  %v1515_v11 = vsub.f32 1.0, %v1451_v57  ;;  %v657_v13 = vsub.f32 %v2045_v1, %v536_v48  ;;  %v2142_v14 = vmax.f32 %v1226_v53, 0.0  ;;  %v118_v53 = vpop.permute.xlu1 %117 }
  0xa7   :  { %v2144_v15 = vmax.f32 %v1227_v58, 0.0  ;;  %v720_v18 = vand.u32 2147483647, %v656_v61  ;;  %v1365_v25 = vsub.f32 %v2043_v63, %v536_v48  ;;  %v2150_v29 = vmax.f32 %v806_v59, 0.0 }
  0xa8   :  { %v2152_v32 = vmax.f32 %v807_v3, 0.0  ;;  %v1516_v22 = vsub.f32 1.0, %v1452_v10  ;;  %v721_v34 = vand.u32 2147483647, %v657_v13  ;;  %v1366_v36 = vsub.f32 %v2052_v5, %v536_v48  ;;  %v612_v48 = vpop.permute.xlu0 %611 }
  0xa9   :  { %3075 = vst [vmem:[#allocation16_spill] sm:$0xff] %v2150_v29  ;;  %v784_v35 = vsub.f32 1.0, %v720_v18  ;;  %v1429_v38 = vand.u32 2147483647, %v1365_v25  ;;  %v686_v40 = vsub.f32 %v2041_v62, %v596_v0  ;;  %1826 = vset.pattern.permute.xlu1 %v3066_v7  ;;  %v2157_v45 = vmax.f32 %v1515_v11, 0.0 }
  0xaa   :  { %3076 = vst [vmem:[#allocation17_spill] sm:$0xff] %v2152_v32  ;;  %v785_v46 = vsub.f32 1.0, %v721_v34  ;;  %v687_v47 = vsub.f32 %v2045_v1, %v596_v0  ;;  %v1395_v52 = vsub.f32 %v2043_v63, %v596_v0  ;;  %232 = vperm.xlu1 %1826, %v50_v27   ;;  %v2161_v54 = vmax.f32 %v1516_v22, 0.0 }
  0xab   :  { %3077 = vst [vmem:[#allocation18_spill] sm:$0xff] %v2157_v45  ;;  %v1430_v50 = vand.u32 2147483647, %v1366_v36  ;;  %v1493_v56 = vsub.f32 1.0, %v1429_v38  ;;  %v750_v57 = vand.u32 2147483647, %v686_v40  ;;  %v1396_v61 = vsub.f32 %v2052_v5, %v596_v0 }
  0xac   :  { %3078 = vst [vmem:[#allocation19_spill] sm:$0xff] %v2161_v54  ;;  %v2163_v58 = vmax.f32 %v784_v35, 0.0  ;;  %v751_v59 = vand.u32 2147483647, %v687_v47  ;;  %v1459_v3 = vand.u32 2147483647, %v1395_v52  ;;  %v263_v18 = vsub.f32 %v2054_v8, %v118_v53 }
  0xad   :  { %v2166_v10 = vmax.f32 %v785_v46, 0.0  ;;  %v1494_v11 = vsub.f32 1.0, %v1430_v50  ;;  %v814_v13 = vsub.f32 1.0, %v750_v57  ;;  %v1460_v34 = vand.u32 2147483647, %v1396_v61 }
  0xae   :  { %v815_v25 = vsub.f32 1.0, %v751_v59  ;;  %v1523_v22 = vsub.f32 1.0, %v1459_v3  ;;  %v264_v36 = vsub.f32 %v2061_v12, %v118_v53  ;;  %1828 = vset.pattern.permute.xlu1 %v3064_v2  ;;  %v2171_v38 = vmax.f32 %v1493_v56, 0.0  ;;  %v628_v56 = vpop.permute.xlu0 %627 }
  0xaf   :  { %v2173_v35 = vmax.f32 %v1494_v11, 0.0  ;;  %v327_v40 = vand.u32 2147483647, %v263_v18  ;;  %v1100_v0 = vsub.f32 %v2067_v16, %v118_v53  ;;  %631 = vperm.xlu1 %1828, %v50_v27   ;;  %v2176_v46 = vmax.f32 %v814_v13, 0.0  ;;  %v51_v11 = vld [vmem:[%s3060_s1 + $0xe0] sm:$0xff] }
  0xb0   :  { %v2178_v47 = vmax.f32 %v815_v25, 0.0  ;;  %v1524_v52 = vsub.f32 1.0, %v1460_v34  ;;  %v328_v50 = vand.u32 2147483647, %v264_v36  ;;  %v1101_v59 = vsub.f32 %v2071_v19, %v118_v53  ;;  %v540_v34 = vpop.permute.xlu1 %539 }
  0xb1   :  { %3079 = vst [vmem:[#allocation20_spill] sm:$0xff] %v2176_v46  ;;  %v391_v57 = vsub.f32 1.0, %v327_v40  ;;  %v1164_v61 = vand.u32 2147483647, %v1100_v0  ;;  %v694_v3 = vsub.f32 %v2041_v62, %v612_v48  ;;  %v2185_v18 = vmax.f32 %v1523_v22, 0.0 }
  0xb2   :  { %3080 = vst [vmem:[#allocation21_spill] sm:$0xff] %v2178_v47  ;;  %v392_v27 = vsub.f32 1.0, %v328_v50  ;;  %v695_v13 = vsub.f32 %v2045_v1, %v612_v48  ;;  %v1403_v25 = vsub.f32 %v2043_v63, %v612_v48  ;;  %v2189_v36 = vmax.f32 %v1524_v52, 0.0 }
  0xb3   :  { %3081 = vst [vmem:[#allocation22_spill] sm:$0xff] %v2185_v18  ;;  %v1165_v40 = vand.u32 2147483647, %v1101_v59  ;;  %v1228_v53 = vsub.f32 1.0, %v1164_v61  ;;  %v758_v0 = vand.u32 2147483647, %v694_v3  ;;  %1829 = vset.pattern.permute.xlu1 %v3066_v7  ;;  %v1404_v2 = vsub.f32 %v2052_v5, %v612_v48 }
  0xb4   :  { %3082 = vst [vmem:[#allocation23_spill] sm:$0xff] %v2189_v36  ;;  %v2192_v28 = vmax.f32 %v391_v57, 0.0  ;;  %v759_v20 = vand.u32 2147483647, %v695_v13  ;;  %v1467_v22 = vand.u32 2147483647, %v1403_v25  ;;  %237 = vperm.xlu1 %1829, %v51_v11   ;;  %v658_v47 = vsub.f32 %v2041_v62, %v540_v34  ;;  %v2204_v25 = vpop.permute.xlu0 %97 }
  0xb5   :  { %v2195_v50 = vmax.f32 %v392_v27, 0.0  ;;  %v1229_v18 = vsub.f32 1.0, %v1165_v40  ;;  %v822_v46 = vsub.f32 1.0, %v758_v0  ;;  %v1468_v36 = vand.u32 2147483647, %v1404_v2 }
  0xb6   :  { %3083 = vst [vmem:[#allocation24_spill] sm:$0xff] %v2192_v28  ;;  %v823_v52 = vsub.f32 1.0, %v759_v20  ;;  %v1531_v59 = vsub.f32 1.0, %v1467_v22  ;;  %v659_v61 = vsub.f32 %v2045_v1, %v540_v34  ;;  %v2199_v3 = vmax.f32 %v1228_v53, 0.0 }
  0xb7   :  { %v2201_v57 = vmax.f32 %v1229_v18, 0.0  ;;  %v722_v13 = vand.u32 2147483647, %v658_v47  ;;  %v1367_v48 = vsub.f32 %v2043_v63, %v540_v34  ;;  %v2206_v27 = vmax.f32 %v822_v46, 0.0 }
  0xb8   :  { %3084 = vst [vmem:[#allocation25_spill] sm:$0xff] %v2199_v3  ;;  %v2208_v40 = vmax.f32 %v823_v52, 0.0  ;;  %v1532_v0 = vsub.f32 1.0, %v1468_v36  ;;  %v723_v7 = vand.u32 2147483647, %v659_v61  ;;  %v3088_v20 = vmov 1   ;;  %v544_v52 = vpop.permute.xlu1 %543  ;;  %v2225_v32 = vpop.permute.xlu0 %102 }
  0xb9   :  { %3085 = vst [vmem:[#allocation26_spill] sm:$0xff] %v2201_v57  ;;  %3086 = vst [vmem:[#allocation27_spill] sm:$0xff] %v2206_v27  ;;  %1830 = vset.pattern.permute.xlu1 %v3088_v20  ;;  %v786_v2 = vsub.f32 1.0, %v722_v13  ;;  %v1368_v22 = vsub.f32 %v2052_v5, %v540_v34  ;;  %v1431_v53 = vand.u32 2147483647, %v1367_v48  ;;  %v702_v18 = vsub.f32 %v2041_v62, %v628_v56 }
  0xba   :  { %3087 = vst [vmem:[#allocation28_spill] sm:$0xff] %v2208_v40  ;;  %635 = vperm.xlu1 %1830, %v51_v11   ;;  %v2213_v47 = vmax.f32 %v1531_v59, 0.0  ;;  %v787_v45 = vsub.f32 1.0, %v723_v7  ;;  %v703_v29 = vsub.f32 %v2045_v1, %v628_v56  ;;  %v1411_v46 = vsub.f32 %v2043_v63, %v628_v56 }
  0xbb   :  { %v2217_v27 = vmax.f32 %v1532_v0, 0.0  ;;  %v1432_v36 = vand.u32 2147483647, %v1368_v22  ;;  %v1495_v61 = vsub.f32 1.0, %v1431_v53  ;;  %v766_v40 = vand.u32 2147483647, %v702_v18 }
  0xbc   :  { %3089 = vst [vmem:[#allocation29_spill] sm:$0xff] %v2213_v47  ;;  %v2219_v13 = vmax.f32 %v786_v2, 0.0  ;;  %v767_v34 = vand.u32 2147483647, %v703_v29  ;;  %v1412_v48 = vsub.f32 %v2052_v5, %v628_v56  ;;  %v1475_v54 = vand.u32 2147483647, %v1411_v46 }
  0xbd   :  { %3090 = vst [vmem:[#allocation30_spill] sm:$0xff] %v2217_v27  ;;  %v2222_v11 = vmax.f32 %v787_v45, 0.0  ;;  %v1496_v59 = vsub.f32 1.0, %v1432_v36  ;;  %v830_v7 = vsub.f32 1.0, %v766_v40  ;;  %v660_v47 = vsub.f32 %v2041_v62, %v544_v52  ;;  %v54_v40 = vld [vmem:[%s3060_s1 + $0xf8] sm:$0xff] }
  0xbe   :  { %3091 = vst [vmem:[#allocation31_spill] sm:$0xff] %v2219_v13  ;;  %639 = vperm.xlu1 %1830, %v2000_v24   ;;  %v831_v0 = vsub.f32 1.0, %v767_v34  ;;  %v1476_v22 = vand.u32 2147483647, %v1412_v48  ;;  %v1539_v53 = vsub.f32 1.0, %v1475_v54  ;;  %v661_v2 = vsub.f32 %v2045_v1, %v544_v52 }
  0xbf   :  { %v2229_v18 = vmax.f32 %v1495_v61, 0.0  ;;  %v2231_v29 = vmax.f32 %v1496_v59, 0.0  ;;  %v724_v56 = vand.u32 2147483647, %v660_v47  ;;  %v1369_v45 = vsub.f32 %v2043_v63, %v544_v52 }
  0xc0   :  { %v2237_v46 = vmax.f32 %v830_v7, 0.0  ;;  %v2239_v36 = vmax.f32 %v831_v0, 0.0  ;;  %v1540_v24 = vsub.f32 1.0, %v1476_v22  ;;  %v725_v34 = vand.u32 2147483647, %v661_v2  ;;  %v133_v22 = vpop.permute.xlu1 %132 }
  0xc1   :  { %3092 = vst [vmem:[#allocation32_spill] sm:$0xff] %v2229_v18  ;;  %3093 = vst [vmem:[#allocation33_spill] sm:$0xff] %v2231_v29  ;;  %v788_v54 = vsub.f32 1.0, %v724_v56  ;;  %v1370_v48 = vsub.f32 %v2052_v5, %v544_v52  ;;  %v1433_v61 = vand.u32 2147483647, %v1369_v45  ;;  %v255_v59 = vsub.f32 %v2054_v8, %v2204_v25 }
  0xc2   :  { %3094 = vst [vmem:[#allocation34_spill] sm:$0xff] %v2237_v46  ;;  %3095 = vst [vmem:[#allocation35_spill] sm:$0xff] %v2239_v36  ;;  %v3096_v47 = vmov 0   ;;  %v2245_v27 = vmax.f32 %v1539_v53, 0.0  ;;  %v789_v44 = vsub.f32 1.0, %v725_v34  ;;  %v1092_v7 = vsub.f32 %v2067_v16, %v2204_v25  ;;  %v108_v46 = vpop.permute.xlu0 %107 }
  0xc3   :  { %1831 = vset.pattern.permute.xlu1 %v3096_v47  ;;  %v257_v0 = vsub.f32 %v2054_v8, %v2225_v32  ;;  %v2251_v2 = vmax.f32 %v1540_v24, 0.0  ;;  %v2253_v52 = vmax.f32 %v788_v54, 0.0  ;;  %v1434_v56 = vand.u32 2147483647, %v1370_v48 }
  0xc4   :  { %3097 = vst [vmem:[#allocation36_spill] sm:$0xff] %v2245_v27  ;;  %252 = vperm.xlu1 %1831, %v54_v40   ;;  %v1497_v45 = vsub.f32 1.0, %v1433_v61  ;;  %v2255_v36 = vmax.f32 %v789_v44, 0.0  ;;  %v2257_v53 = vand.u32 2147483647, %v255_v59  ;;  %v1094_v47 = vsub.f32 %v2067_v16, %v2225_v32  ;;  %v552_v3 = vpop.permute.xlu1 %551 }
  0xc5   :  { %3098 = vst [vmem:[#allocation37_spill] sm:$0xff] %v2251_v2  ;;  %3099 = vst [vmem:[#allocation38_spill] sm:$0xff] %v2253_v52  ;;  %v2259_v34 = vand.u32 2147483647, %v1092_v7  ;;  %v1498_v27 = vsub.f32 1.0, %v1434_v56  ;;  %v269_v24 = vsub.f32 %v2054_v8, %v133_v22  ;;  %v270_v54 = vsub.f32 %v2061_v12, %v133_v22 }
  0xc6   :  { %v2263_v30 = vand.u32 2147483647, %v257_v0  ;;  %v2267_v2 = vmax.f32 %v1497_v45, 0.0  ;;  %v1106_v48 = vsub.f32 %v2067_v16, %v133_v22  ;;  %v1107_v44 = vsub.f32 %v2071_v19, %v133_v22 }
  0xc7   :  { %v259_v61 = vsub.f32 %v2054_v8, %v108_v46  ;;  %v2273_v59 = vand.u32 2147483647, %v1094_v47  ;;  %v333_v7 = vand.u32 2147483647, %v269_v24  ;;  %v334_v56 = vand.u32 2147483647, %v270_v54 }
  0xc8   :  { %3100 = vst [vmem:[#allocation39_spill] sm:$0xff] %v2267_v2  ;;  %1833 = vset.pattern.permute.xlu1 %v3088_v20  ;;  %v260_v0 = vsub.f32 %v2061_v12, %v108_v46  ;;  %v1170_v49 = vand.u32 2147483647, %v1106_v48  ;;  %v1171_v31 = vand.u32 2147483647, %v1107_v44  ;;  %v1096_v45 = vsub.f32 %v2067_v16, %v108_v46  ;;  %v123_v44 = vpop.permute.xlu0 %122 }
  0xc9   :  { %647 = vperm.xlu1 %1833, %v54_v40   ;;  %v323_v21 = vand.u32 2147483647, %v259_v61  ;;  %v397_v6 = vsub.f32 1.0, %v333_v7  ;;  %v398_v23 = vsub.f32 1.0, %v334_v56  ;;  %v1097_v22 = vsub.f32 %v2071_v19, %v108_v46 }
  0xca   :  { %v324_v9 = vand.u32 2147483647, %v260_v0  ;;  %v1234_v2 = vsub.f32 1.0, %v1170_v49  ;;  %v1235_v18 = vsub.f32 1.0, %v1171_v31  ;;  %v1160_v47 = vand.u32 2147483647, %v1096_v45 }
  0xcb   :  { %v387_v20 = vsub.f32 1.0, %v323_v21  ;;  %v2278_v24 = vmax.f32 %v1498_v27, 0.0  ;;  %v2280_v54 = vmax.f32 %v397_v6, 0.0  ;;  %v1161_v48 = vand.u32 2147483647, %v1097_v22 }
  0xcc   :  { %v388_v40 = vsub.f32 1.0, %v324_v9  ;;  %v2282_v61 = vmax.f32 %v398_v23, 0.0  ;;  %v2284_v52 = vmax.f32 %v1234_v2, 0.0  ;;  %v2286_v7 = vmax.f32 %v1235_v18, 0.0 }
  0xcd   :  { %3101 = vst [vmem:[#allocation40_spill] sm:$0xff] %v2278_v24  ;;  %3102 = vst [vmem:[#allocation41_spill] sm:$0xff] %v2280_v54  ;;  %v1224_v56 = vsub.f32 1.0, %v1160_v47  ;;  %v2288_v46 = vmax.f32 %v387_v20, 0.0  ;;  %v664_v21 = vsub.f32 %v2041_v62, %v552_v3  ;;  %v665_v49 = vsub.f32 %v2045_v1, %v552_v3 }
  0xce   :  { %3103 = vst [vmem:[#allocation42_spill] sm:$0xff] %v2282_v61  ;;  %3104 = vst [vmem:[#allocation43_spill] sm:$0xff] %v2284_v52  ;;  %v2290_v31 = vmax.f32 %v388_v40, 0.0  ;;  %v1225_v6 = vsub.f32 1.0, %v1161_v48  ;;  %v1373_v9 = vsub.f32 %v2043_v63, %v552_v3  ;;  %v1374_v27 = vsub.f32 %v2052_v5, %v552_v3 }
  0xcf   :  { %3105 = vst [vmem:[#allocation44_spill] sm:$0xff] %v2286_v7  ;;  %v265_v23 = vsub.f32 %v2054_v8, %v123_v44  ;;  %v2297_v2 = vmax.f32 %v1224_v56, 0.0  ;;  %v728_v18 = vand.u32 2147483647, %v664_v21  ;;  %v729_v0 = vand.u32 2147483647, %v665_v49  ;;  %v138_v56 = vpop.permute.xlu1 %137 }
  0xd0   :  { %v266_v45 = vsub.f32 %v2061_v12, %v123_v44  ;;  %v1437_v22 = vand.u32 2147483647, %v1373_v9  ;;  %v1438_v20 = vand.u32 2147483647, %v1374_v27  ;;  %v1102_v40 = vsub.f32 %v2067_v16, %v123_v44  ;;  %v128_v27 = vpop.permute.xlu0 %127 }
  0xd1   :  { %v329_v47 = vand.u32 2147483647, %v265_v23  ;;  %v792_v52 = vsub.f32 1.0, %v728_v18  ;;  %v793_v54 = vsub.f32 1.0, %v729_v0  ;;  %v1103_v7 = vsub.f32 %v2071_v19, %v123_v44 }
  0xd2   :  { %v330_v48 = vand.u32 2147483647, %v266_v45  ;;  %v1501_v61 = vsub.f32 1.0, %v1437_v22  ;;  %v1502_v3 = vsub.f32 1.0, %v1438_v20  ;;  %v1166_v28 = vand.u32 2147483647, %v1102_v40 }
  0xd3   :  { %v393_v13 = vsub.f32 1.0, %v329_v47  ;;  %v2302_v24 = vmax.f32 %v1225_v6, 0.0  ;;  %v2304_v21 = vmax.f32 %v792_v52, 0.0  ;;  %v1167_v9 = vand.u32 2147483647, %v1103_v7 }
  0xd4   :  { %v394_v49 = vsub.f32 1.0, %v330_v48  ;;  %v2306_v23 = vmax.f32 %v793_v54, 0.0  ;;  %v2308_v29 = vmax.f32 %v1501_v61, 0.0  ;;  %v2310_v18 = vmax.f32 %v1502_v3, 0.0 }
  0xd5   :  { %3106 = vst [vmem:[#allocation45_spill] sm:$0xff] %v2304_v21  ;;  %v1230_v0 = vsub.f32 1.0, %v1166_v28  ;;  %v2312_v44 = vmax.f32 %v393_v13, 0.0  ;;  %v271_v22 = vsub.f32 %v2054_v8, %v138_v56  ;;  %v272_v6 = vsub.f32 %v2061_v12, %v138_v56 }
  0xd6   :  { %3107 = vst [vmem:[#allocation46_spill] sm:$0xff] %v2306_v23  ;;  %3108 = vst [vmem:[#allocation47_spill] sm:$0xff] %v2308_v29  ;;  %v2314_v45 = vmax.f32 %v394_v49, 0.0  ;;  %v1231_v52 = vsub.f32 1.0, %v1167_v9  ;;  %v1108_v20 = vsub.f32 %v2067_v16, %v138_v56  ;;  %v1109_v7 = vsub.f32 %v2071_v19, %v138_v56 }
  0xd7   :  { %3109 = vst [vmem:[#allocation48_spill] sm:$0xff] %v2310_v18  ;;  %3110 = vst [vmem:[#allocation49_spill] sm:$0xff] %v2312_v44  ;;  %v267_v54 = vsub.f32 %v2054_v8, %v128_v27  ;;  %v2321_v61 = vmax.f32 %v1230_v0, 0.0  ;;  %v335_v47 = vand.u32 2147483647, %v271_v22  ;;  %v268_v28 = vsub.f32 %v2061_v12, %v128_v27 }
  0xd8   :  { %v336_v40 = vand.u32 2147483647, %v272_v6  ;;  %v1172_v13 = vand.u32 2147483647, %v1108_v20  ;;  %v1173_v48 = vand.u32 2147483647, %v1109_v7  ;;  %v1104_v49 = vsub.f32 %v2067_v16, %v128_v27 }
  0xd9   :  { %3111 = vst [vmem:[#allocation50_spill] sm:$0xff] %v2321_v61  ;;  %v331_v3 = vand.u32 2147483647, %v267_v54  ;;  %v399_v29 = vsub.f32 1.0, %v335_v47  ;;  %v332_v9 = vand.u32 2147483647, %v268_v28  ;;  %v1105_v18 = vsub.f32 %v2071_v19, %v128_v27 }
  0xda   :  { %v400_v21 = vsub.f32 1.0, %v336_v40  ;;  %v1236_v23 = vsub.f32 1.0, %v1172_v13  ;;  %v1237_v56 = vsub.f32 1.0, %v1173_v48  ;;  %v1168_v57 = vand.u32 2147483647, %v1104_v49 }
  0xdb   :  { %v395_v44 = vsub.f32 1.0, %v331_v3  ;;  %v2326_v0 = vmax.f32 %v1231_v52, 0.0  ;;  %v2328_v22 = vmax.f32 %v399_v29, 0.0  ;;  %v396_v6 = vsub.f32 1.0, %v332_v9 }
  0xdc   :  { %v2330_v61 = vand.u32 2147483647, %v1105_v18  ;;  %v2332_v20 = vmax.f32 %v400_v21, 0.0  ;;  %v2334_v7 = vmax.f32 %v1236_v23, 0.0  ;;  %v2336_v54 = vmax.f32 %v1237_v56, 0.0 }
  0xdd   :  { %3112 = vst [vmem:[#allocation51_spill] sm:$0xff] %v2328_v22  ;;  %v1232_v47 = vsub.f32 1.0, %v1168_v57  ;;  %v2338_v40 = vmax.f32 %v395_v44, 0.0  ;;  %v2340_v27 = vmax.f32 %v396_v6, 0.0  ;;  %v256_v52 = vsub.f32 %v2061_v12, %v2204_v25 }
  0xde   :  { %3113 = vst [vmem:[#allocation52_spill] sm:$0xff] %v2332_v20  ;;  %3114 = vst [vmem:[#allocation53_spill] sm:$0xff] %v2334_v7  ;;  %v258_v29 = vsub.f32 %v2061_v12, %v2225_v32  ;;  %v653_v21 = vsub.f32 %v2045_v1, %v2075_v26  ;;  %v3118_v23 = vsub.f32 %v2045_v1, %v2050_v4 }
  0xdf   :  { %3115 = vst [vmem:[#allocation54_spill] sm:$0xff] %v2336_v54  ;;  %3116 = vst [vmem:[#allocation55_spill] sm:$0xff] %v2338_v40  ;;  %v1093_v57 = vsub.f32 %v2071_v19, %v2204_v25  ;;  %v2354_v44 = vmax.f32 %v1232_v47, 0.0  ;;  %v320_v13 = vand.u32 2147483647, %v256_v52  ;;  %v1095_v3 = vsub.f32 %v2071_v19, %v2225_v32 }
  0xe0   :  { %3117 = vst [vmem:[#allocation56_spill] sm:$0xff] %v2340_v27  ;;  %v715_v28 = vand.u32 2147483647, %v3118_v23  ;;  %v322_v48 = vand.u32 2147483647, %v258_v29  ;;  %v1362_v6 = vsub.f32 %v2052_v5, %v2075_v26  ;;  %v3120_v23 = vsub.f32 %v2052_v5, %v2050_v4 }
  0xe1   :  { %3119 = vst [vmem:[#allocation57_spill] sm:$0xff] %v2354_v44  ;;  %v717_v49 = vand.u32 2147483647, %v653_v21  ;;  %v1157_v56 = vand.u32 2147483647, %v1093_v57  ;;  %v384_v18 = vsub.f32 1.0, %v320_v13 }
  0xe2   :  { %v779_v9 = vsub.f32 1.0, %v715_v28  ;;  %v386_v7 = vsub.f32 1.0, %v322_v48  ;;  %v1159_v22 = vand.u32 2147483647, %v1095_v3  ;;  %v1424_v25 = vand.u32 2147483647, %v3120_v23 }
  0xe3   :  { %v781_v47 = vsub.f32 1.0, %v717_v49  ;;  %v1221_v52 = vsub.f32 1.0, %v1157_v56  ;;  %v1426_v29 = vand.u32 2147483647, %v1362_v6  ;;  %v448_v20 = vmax.f32 %v384_v18, 0.0  ;;  %v556_v6 = vpop.permute.xlu1 %555 }
  0xe4   :  { %v843_v54 = vmax.f32 %v779_v9, 0.0  ;;  %v450_v44 = vmax.f32 %v386_v7, 0.0  ;;  %v1223_v32 = vsub.f32 1.0, %v1159_v22  ;;  %v1488_v21 = vsub.f32 1.0, %v1424_v25 }
  0xe5   :  { %v845_v28 = vmax.f32 %v781_v47, 0.0  ;;  %v1285_v57 = vmax.f32 %v1221_v52, 0.0  ;;  %v1490_v40 = vsub.f32 1.0, %v1426_v29  ;;  %v383_v26 = vsub.f32 1.0, %v2257_v53 }
  0xe6   :  { %v907_v13 = vmul.f32 %v843_v54, %v448_v20  ;;  %v1287_v48 = vmax.f32 %v1223_v32, 0.0  ;;  %v1552_v3 = vmax.f32 %v1488_v21, 0.0  ;;  %v385_v27 = vsub.f32 1.0, %v2263_v30 }
  0xe7   :  { %v909_v4 = vmul.f32 %v845_v28, %v450_v44  ;;  %v1554_v23 = vmax.f32 %v1490_v40, 0.0  ;;  %v447_v49 = vmax.f32 %v383_v26, 0.0  ;;  %v778_v9 = vsub.f32 1.0, %v2069_v17  ;;  %v143_v28 = vpop.permute.xlu0 %142 }
  0xe8   :  { %v1616_v56 = vmul.f32 %v1552_v3, %v1285_v57  ;;  %v449_v18 = vmax.f32 %v385_v27, 0.0  ;;  %v780_v22 = vsub.f32 1.0, %v2090_v39  ;;  %v1220_v7 = vsub.f32 1.0, %v2259_v34 }
  0xe9   :  { %v977_v25 = vpack.c.bf16 %v909_v4, %v907_v13  ;;  %v1618_v47 = vmul.f32 %v1554_v23, %v1287_v48  ;;  %v842_v53 = vmax.f32 %v778_v9, 0.0  ;;  %v1222_v20 = vsub.f32 1.0, %v2273_v59 }
  0xea   :  { %v844_v54 = vmax.f32 %v780_v22, 0.0  ;;  %v1284_v52 = vmax.f32 %v1220_v7, 0.0  ;;  %v1487_v30 = vsub.f32 1.0, %v2084_v33  ;;  %v1489_v40 = vsub.f32 1.0, %v2097_v43 }
  0xeb   :  { %1008 = vmatprep.subr.bf16.mxu0 %v977_v25  ;;  %v1687_v17 = vpack.c.bf16 %v1618_v47, %v1616_v56  ;;  %v906_v44 = vmul.f32 %v842_v53, %v447_v49  ;;  %v1286_v27 = vmax.f32 %v1222_v20, 0.0  ;;  %v666_v39 = vsub.f32 %v2041_v62, %v556_v6 }
  0xec   :  { %v908_v29 = vmul.f32 %v844_v54, %v449_v18  ;;  %v1551_v34 = vmax.f32 %v1487_v30, 0.0  ;;  %v1553_v32 = vmax.f32 %v1489_v40, 0.0  ;;  %v667_v21 = vsub.f32 %v2045_v1, %v556_v6 }
  0xed   :  { %1718 = vmatprep.subr.bf16.mxu1 %v1687_v17  ;;  %v730_v59 = vand.u32 2147483647, %v666_v39  ;;  %v1375_v57 = vsub.f32 %v2043_v63, %v556_v6  ;;  %v1376_v33 = vsub.f32 %v2052_v5, %v556_v6  ;;  %v273_v43 = vsub.f32 %v2054_v8, %v143_v28 }
  0xee   :  { %v976_v26 = vpack.c.bf16 %v908_v29, %v906_v44  ;;  %v1615_v13 = vmul.f32 %v1551_v34, %v1284_v52  ;;  %v1617_v48 = vmul.f32 %v1553_v32, %v1286_v27  ;;  %v731_v3 = vand.u32 2147483647, %v667_v21  ;;  %v560_v21 = vpop.permute.xlu1 %559 }
  0xef   :  { %v794_v4 = vsub.f32 1.0, %v730_v59  ;;  %v1439_v23 = vand.u32 2147483647, %v1375_v57  ;;  %v1440_v49 = vand.u32 2147483647, %v1376_v33  ;;  %v274_v9 = vsub.f32 %v2061_v12, %v143_v28 }
  0xf0   :  { %1009 = vmatpush1.bf16.msra.mxu0 %v976_v26  ;;  %v1686_v56 = vpack.c.bf16 %v1617_v48, %v1615_v13  ;;  %v795_v18 = vsub.f32 1.0, %v731_v3  ;;  %v337_v22 = vand.u32 2147483647, %v273_v43  ;;  %v1110_v7 = vsub.f32 %v2067_v16, %v143_v28  ;;  %v148_v13 = vpop.permute.xlu0 %147 }
  0xf1   :  { %v3121_v25 = vsub.f32 1.0, %v2330_v61  ;;  %v1503_v47 = vsub.f32 1.0, %v1439_v23  ;;  %v1504_v53 = vsub.f32 1.0, %v1440_v49  ;;  %v338_v20 = vand.u32 2147483647, %v274_v9 }
  0xf2   :  { %1719 = vmatpush1.bf16.msra.mxu1 %v1686_v56  ;;  %v2382_v54 = vmax.f32 %v794_v4, 0.0  ;;  %v401_v52 = vsub.f32 1.0, %v337_v22  ;;  %v1111_v30 = vsub.f32 %v2071_v19, %v143_v28  ;;  %v1174_v40 = vand.u32 2147483647, %v1110_v7 }
  0xf3   :  { %v2380_v6 = vmax.f32 %v3121_v25, 0.0  ;;  %v2385_v17 = vmax.f32 %v795_v18, 0.0  ;;  %v2387_v44 = vmax.f32 %v1503_v47, 0.0  ;;  %v402_v27 = vsub.f32 1.0, %v338_v20 }
  0xf4   :  { %v911_v61 = vmul.f32 %v2093_v41, %v2290_v31  ;;  %v2391_v39 = vmax.f32 %v1504_v53, 0.0  ;;  %v1175_v29 = vand.u32 2147483647, %v1111_v30  ;;  %v1238_v34 = vsub.f32 1.0, %v1174_v40 }
  0xf5   :  { %v913_v32 = vmul.f32 %v2166_v10, %v2137_v51  ;;  %v2395_v59 = vmax.f32 %v401_v52, 0.0  ;;  %v1620_v28 = vmul.f32 %v2108_v60, %v2302_v24  ;;  %v1622_v57 = vmul.f32 %v2173_v35, %v2144_v15 }
  0xf6   :  { %v910_v33 = vmul.f32 %v2088_v37, %v2288_v46  ;;  %v2403_v41 = vmax.f32 %v402_v27, 0.0  ;;  %v1239_v31 = vsub.f32 1.0, %v1175_v29  ;;  %v912_v26 = vmul.f32 %v2163_v58, %v2134_v55 }
  0xf7   :  { %v979_v43 = vpack.c.bf16 %v913_v32, %v911_v61  ;;  %v1689_v51 = vpack.c.bf16 %v1622_v57, %v1620_v28  ;;  %v1619_v10 = vmul.f32 %v2095_v42, %v2297_v2  ;;  %v1621_v60 = vmul.f32 %v2171_v38, %v2142_v14 }
  0xf8   :  { %v668_v24 = vsub.f32 %v2041_v62, %v560_v21  ;;  %v2412_v15 = vmax.f32 %v1238_v34, 0.0  ;;  %v978_v37 = vpack.c.bf16 %v912_v26, %v910_v33  ;;  %v669_v35 = vsub.f32 %v2045_v1, %v560_v21 }
  0xf9   :  { %1010 = vmatprep.subr.bf16.mxu0 %v979_v43  ;;  %v1377_v46 = vsub.f32 %v2043_v63, %v560_v21  ;;  %1720 = vmatprep.subr.bf16.mxu1 %v1689_v51  ;;  %v1688_v55 = vpack.c.bf16 %v1621_v60, %v1619_v10  ;;  %v1378_v48 = vsub.f32 %v2052_v5, %v560_v21  ;;  %v2421_v25 = vmax.f32 %v1239_v31, 0.0  ;;  %v3122_v31 = vld [vmem:[#allocation26_spill] sm:$0xff]  ;;  %v3123_v43 = vld [vmem:[#allocation33_spill] sm:$0xff]  ;;  %v3124_v51 = vld [vmem:[#allocation40_spill] sm:$0xff] }
  0xfa   :  { %v732_v58 = vand.u32 2147483647, %v668_v24  ;;  %v275_v42 = vsub.f32 %v2054_v8, %v148_v13  ;;  %1011 = vmatpush1.bf16.msra.mxu0 %v978_v37  ;;  %v733_v14 = vand.u32 2147483647, %v669_v35  ;;  %v276_v2 = vsub.f32 %v2061_v12, %v148_v13  ;;  %v3125_v60 = vld [vmem:[#allocation24_spill] sm:$0xff]  ;;  %v3126_v24 = vld [vmem:[#allocation31_spill] sm:$0xff] }
  0xfb   :  { %v1441_v38 = vand.u32 2147483647, %v1377_v46  ;;  %v1112_v3 = vsub.f32 %v2067_v16, %v148_v13  ;;  %1721 = vmatpush1.bf16.msra.mxu1 %v1688_v55  ;;  %v1442_v23 = vand.u32 2147483647, %v1378_v48  ;;  %v1113_v9 = vsub.f32 %v2071_v19, %v148_v13  ;;  %v3127_v35 = vld [vmem:[#allocation49_spill] sm:$0xff]  ;;  %v3128_v46 = vld [vmem:[#allocation38_spill] sm:$0xff]  ;;  %v163_v55 = vpop.permute.xlu0 %162 }
  0xfc   :  { %v796_v4 = vsub.f32 1.0, %v732_v58  ;;  %v339_v49 = vand.u32 2147483647, %v275_v42  ;;  %v797_v56 = vsub.f32 1.0, %v733_v14  ;;  %v340_v22 = vand.u32 2147483647, %v276_v2  ;;  %v153_v58 = vpop.permute.xlu1 %152 }
  0xfd   :  { %v1505_v18 = vsub.f32 1.0, %v1441_v38  ;;  %v1176_v7 = vand.u32 2147483647, %v1112_v3  ;;  %v1506_v47 = vsub.f32 1.0, %v1442_v23  ;;  %v1177_v20 = vand.u32 2147483647, %v1113_v9 }
  0xfe   :  { %v403_v53 = vsub.f32 1.0, %v339_v49  ;;  %v2423_v52 = vmax.f32 %v796_v4, 0.0  ;;  %v2425_v30 = vmax.f32 %v797_v56, 0.0  ;;  %v404_v40 = vsub.f32 1.0, %v340_v22  ;;  %v3129_v42 = vld [vmem:[#allocation25_spill] sm:$0xff]  ;;  %v3131_v14 = vld [vmem:[#allocation50_spill] sm:$0xff] }
  0xff   :  { %v1240_v27 = vsub.f32 1.0, %v1176_v7  ;;  %v2427_v61 = vmax.f32 %v1505_v18, 0.0  ;;  %v2429_v29 = vmax.f32 %v1506_v47, 0.0  ;;  %v1241_v32 = vsub.f32 1.0, %v1177_v20 }
 0x100   :  { %v2431_v34 = vmax.f32 %v403_v53, 0.0  ;;  %v2433_v21 = vmax.f32 %v404_v40, 0.0  ;;  %v915_v57 = vmul.f32 %v2222_v11, %v2195_v50  ;;  %v917_v33 = vmul.f32 %v2255_v36, %v2314_v45  ;;  %v3130_v50 = vld [vmem:[#allocation32_spill] sm:$0xff]  ;;  %v3132_v36 = vld [vmem:[#allocation39_spill] sm:$0xff] }
 0x101   :  { %v2435_v28 = vmax.f32 %v1240_v27, 0.0  ;;  %v1624_v26 = vmul.f32 %v3123_v43, %v3122_v31  ;;  %v1626_v10 = vmul.f32 %v3124_v51, %v2326_v0  ;;  %v914_v37 = vmul.f32 %v3126_v24, %v3125_v60 }
 0x102   :  { %v916_v13 = vmul.f32 %v3128_v46, %v3127_v35  ;;  %v981_v48 = vpack.c.bf16 %v917_v33, %v915_v57  ;;  %v1623_v11 = vmul.f32 %v3130_v50, %v3129_v42  ;;  %v1625_v45 = vmul.f32 %v3132_v36, %v3131_v14  ;;  %v3134_v42 = vld [vmem:[#allocation9_spill] sm:$0xff]  ;;  %v3135_v14 = vld [vmem:[#allocation42_spill] sm:$0xff] }
 0x103   :  { %v281_v38 = vsub.f32 %v2054_v8, %v163_v55  ;;  %v1691_v2 = vpack.c.bf16 %v1626_v10, %v1624_v26  ;;  %v282_v0 = vsub.f32 %v2061_v12, %v163_v55  ;;  %v1118_v4 = vsub.f32 %v2067_v16, %v163_v55  ;;  %v3136_v36 = vld [vmem:[#allocation46_spill] sm:$0xff] }
 0x104   :  { %v980_v3 = vpack.c.bf16 %v916_v13, %v914_v37  ;;  %1012 = vmatprep.subr.bf16.mxu0 %v981_v48  ;;  %v1690_v23 = vpack.c.bf16 %v1625_v45, %v1623_v11  ;;  %v1119_v9 = vsub.f32 %v2071_v19, %v163_v55  ;;  %v277_v56 = vsub.f32 %v2054_v8, %v153_v58  ;;  %v3133_v48 = vld [vmem:[#allocation56_spill] sm:$0xff] }
 0x105   :  { %v345_v49 = vand.u32 2147483647, %v281_v38  ;;  %1722 = vmatprep.subr.bf16.mxu1 %v1691_v2  ;;  %v346_v18 = vand.u32 2147483647, %v282_v0  ;;  %v1182_v22 = vand.u32 2147483647, %v1118_v4  ;;  %v278_v7 = vsub.f32 %v2061_v12, %v153_v58 }
 0x106   :  { %1013 = vmatpush1.bf16.msra.mxu0 %v980_v3  ;;  %v1114_v47 = vsub.f32 %v2067_v16, %v153_v58  ;;  %1723 = vmatpush1.bf16.msra.mxu1 %v1690_v23  ;;  %v1183_v20 = vand.u32 2147483647, %v1119_v9  ;;  %v341_v40 = vand.u32 2147483647, %v277_v56  ;;  %v1115_v27 = vsub.f32 %v2071_v19, %v153_v58  ;;  %v3137_v38 = vld [vmem:[#allocation11_spill] sm:$0xff]  ;;  %v3138_v0 = vld [vmem:[#allocation44_spill] sm:$0xff] }
 0x107   :  { %v409_v53 = vsub.f32 1.0, %v345_v49  ;;  %v410_v57 = vsub.f32 1.0, %v346_v18  ;;  %v1246_v33 = vsub.f32 1.0, %v1182_v22  ;;  %v342_v31 = vand.u32 2147483647, %v278_v7  ;;  %v3139_v4 = vld [vmem:[#allocation48_spill] sm:$0xff] }
 0x108   :  { %v1178_v43 = vand.u32 2147483647, %v1114_v47  ;;  %v2461_v26 = vmax.f32 %v1241_v32, 0.0  ;;  %v1247_v51 = vsub.f32 1.0, %v1183_v20  ;;  %v405_v10 = vsub.f32 1.0, %v341_v40  ;;  %v3140_v49 = vld [vmem:[#allocation55_spill] sm:$0xff]  ;;  %v168_v47 = vpop.permute.xlu0 %167 }
 0x109   :  { %v1179_v60 = vand.u32 2147483647, %v1115_v27  ;;  %v2463_v24 = vmax.f32 %v409_v53, 0.0  ;;  %v2465_v37 = vmax.f32 %v410_v57, 0.0  ;;  %v406_v35 = vsub.f32 1.0, %v342_v31  ;;  %v3141_v9 = vld [vmem:[#allocation8_spill] sm:$0xff]  ;;  %v568_v53 = vpop.permute.xlu1 %567 }
 0x10a   :  { %v1242_v46 = vsub.f32 1.0, %v1178_v43  ;;  %v2467_v13 = vmax.f32 %v1246_v33, 0.0  ;;  %v2469_v55 = vmax.f32 %v1247_v51, 0.0  ;;  %v2471_v58 = vmax.f32 %v405_v10, 0.0  ;;  %v3142_v18 = vld [vmem:[#allocation41_spill] sm:$0xff]  ;;  %v3145_v27 = vld [vmem:[#allocation10_spill] sm:$0xff] }
 0x10b   :  { %v919_v50 = vmul.f32 %v3134_v42, %v3133_v48  ;;  %v2475_v32 = vmax.f32 %v406_v35, 0.0  ;;  %v1243_v11 = vsub.f32 1.0, %v1179_v60  ;;  %v921_v45 = vmul.f32 %v3136_v36, %v3135_v14  ;;  %v3143_v22 = vld [vmem:[#allocation45_spill] sm:$0xff]  ;;  %v3146_v33 = vld [vmem:[#allocation43_spill] sm:$0xff] }
 0x10c   :  { %v1628_v2 = vmul.f32 %v3137_v38, %v2380_v6  ;;  %v2481_v3 = vmax.f32 %v1242_v46, 0.0  ;;  %v1630_v23 = vmul.f32 %v3139_v4, %v3138_v0  ;;  %v918_v56 = vmul.f32 %v3141_v9, %v3140_v49  ;;  %v3144_v40 = vld [vmem:[#allocation57_spill] sm:$0xff]  ;;  %v3147_v31 = vld [vmem:[#allocation47_spill] sm:$0xff] }
 0x10d   :  { %v920_v7 = vmul.f32 %v3143_v22, %v3142_v18  ;;  %v983_v20 = vpack.c.bf16 %v921_v45, %v919_v50  ;;  %v1627_v57 = vmul.f32 %v3145_v27, %v3144_v40  ;;  %v1629_v6 = vmul.f32 %v3147_v31, %v3146_v33  ;;  %v183_v31 = vpop.permute.xlu0 %182 }
 0x10e   :  { %v283_v43 = vsub.f32 %v2054_v8, %v168_v47  ;;  %v1693_v51 = vpack.c.bf16 %v1630_v23, %v1628_v2  ;;  %v284_v60 = vsub.f32 %v2061_v12, %v168_v47  ;;  %v1120_v35 = vsub.f32 %v2067_v16, %v168_v47 }
 0x10f   :  { %v982_v10 = vpack.c.bf16 %v920_v7, %v918_v56  ;;  %1014 = vmatprep.subr.bf16.mxu0 %v983_v20  ;;  %v1692_v46 = vpack.c.bf16 %v1629_v6, %v1627_v57  ;;  %v1121_v42 = vsub.f32 %v2071_v19, %v168_v47  ;;  %v672_v50 = vsub.f32 %v2041_v62, %v568_v53 }
 0x110   :  { %v347_v48 = vand.u32 2147483647, %v283_v43  ;;  %1724 = vmatprep.subr.bf16.mxu1 %v1693_v51  ;;  %v348_v14 = vand.u32 2147483647, %v284_v60  ;;  %v1184_v36 = vand.u32 2147483647, %v1120_v35  ;;  %v673_v45 = vsub.f32 %v2045_v1, %v568_v53 }
 0x111   :  { %1015 = vmatpush1.bf16.msra.mxu0 %v982_v10  ;;  %v1381_v38 = vsub.f32 %v2043_v63, %v568_v53  ;;  %1725 = vmatpush1.bf16.msra.mxu1 %v1692_v46  ;;  %v1185_v0 = vand.u32 2147483647, %v1121_v42  ;;  %v736_v4 = vand.u32 2147483647, %v672_v50  ;;  %v1382_v23 = vsub.f32 %v2052_v5, %v568_v53  ;;  %v3148_v50 = vld [vmem:[#allocation52_spill] sm:$0xff] }
 0x112   :  { %v411_v2 = vsub.f32 1.0, %v347_v48  ;;  %v412_v49 = vsub.f32 1.0, %v348_v14  ;;  %v1248_v9 = vsub.f32 1.0, %v1184_v36  ;;  %v737_v56 = vand.u32 2147483647, %v673_v45 }
 0x113   :  { %v1445_v18 = vand.u32 2147483647, %v1381_v38  ;;  %v2501_v22 = vmax.f32 %v1243_v11, 0.0  ;;  %v1249_v7 = vsub.f32 1.0, %v1185_v0  ;;  %v800_v47 = vsub.f32 1.0, %v736_v4 }
 0x114   :  { %v1446_v20 = vand.u32 2147483647, %v1382_v23  ;;  %v2503_v40 = vmax.f32 %v411_v2, 0.0  ;;  %v2505_v27 = vmax.f32 %v412_v49, 0.0  ;;  %v801_v57 = vsub.f32 1.0, %v737_v56  ;;  %v3149_v2 = vld [vmem:[#allocation54_spill] sm:$0xff] }
 0x115   :  { %v1509_v33 = vsub.f32 1.0, %v1445_v18  ;;  %v2507_v6 = vmax.f32 %v1248_v9, 0.0  ;;  %v2509_v43 = vmax.f32 %v1249_v7, 0.0  ;;  %v2511_v53 = vmax.f32 %v800_v47, 0.0  ;;  %v3150_v9 = vld [vmem:[#allocation51_spill] sm:$0xff] }
 0x116   :  { %v289_v51 = vsub.f32 %v2054_v8, %v183_v31  ;;  %v2514_v11 = vmax.f32 %v801_v57, 0.0  ;;  %v1510_v10 = vsub.f32 1.0, %v1446_v20  ;;  %v290_v60 = vsub.f32 %v2061_v12, %v183_v31  ;;  %v158_v20 = vpop.permute.xlu1 %157 }
 0x117   :  { %v1126_v35 = vsub.f32 %v2067_v16, %v183_v31  ;;  %v2518_v46 = vmax.f32 %v1509_v33, 0.0  ;;  %v1127_v42 = vsub.f32 %v2071_v19, %v183_v31  ;;  %v923_v14 = vmul.f32 %v2385_v17, %v3148_v50 }
 0x118   :  { %v353_v48 = vand.u32 2147483647, %v289_v51  ;;  %v354_v36 = vand.u32 2147483647, %v290_v60  ;;  %v925_v38 = vmul.f32 %v2425_v30, %v2403_v41  ;;  %v1632_v0 = vmul.f32 %v2391_v39, %v3149_v2  ;;  %v188_v60 = vpop.permute.xlu0 %187 }
 0x119   :  { %v1190_v45 = vand.u32 2147483647, %v1126_v35  ;;  %v1191_v23 = vand.u32 2147483647, %v1127_v42  ;;  %v1634_v49 = vmul.f32 %v2429_v29, %v2421_v25  ;;  %v922_v56 = vmul.f32 %v2382_v54, %v3150_v9  ;;  %v3151_v29 = vld [vmem:[#allocation53_spill] sm:$0xff] }
 0x11a   :  { %v417_v4 = vsub.f32 1.0, %v353_v48  ;;  %v418_v18 = vsub.f32 1.0, %v354_v36  ;;  %v985_v47 = vpack.c.bf16 %v925_v38, %v923_v14  ;;  %v924_v17 = vmul.f32 %v2423_v52, %v2395_v59 }
 0x11b   :  { %v1254_v7 = vsub.f32 1.0, %v1190_v45  ;;  %v2533_v57 = vmax.f32 %v1510_v10, 0.0  ;;  %v1255_v39 = vsub.f32 1.0, %v1191_v23  ;;  %v1695_v30 = vpack.c.bf16 %v1634_v49, %v1632_v0 }
 0x11c   :  { %v2535_v41 = vmax.f32 %v417_v4, 0.0  ;;  %v2537_v33 = vmax.f32 %v418_v18, 0.0  ;;  %1016 = vmatprep.subr.bf16.mxu0 %v985_v47  ;;  %v984_v25 = vpack.c.bf16 %v924_v17, %v922_v56  ;;  %v1631_v54 = vmul.f32 %v2387_v44, %v3151_v29  ;;  %v572_v47 = vpop.permute.xlu1 %571 }
 0x11d   :  { %v1633_v31 = vmul.f32 %v2427_v61, %v2412_v15  ;;  %v2543_v51 = vmax.f32 %v1254_v7, 0.0  ;;  %1726 = vmatprep.subr.bf16.mxu1 %v1695_v30  ;;  %v279_v59 = vsub.f32 %v2054_v8, %v158_v20  ;;  %v280_v52 = vsub.f32 %v2061_v12, %v158_v20 }
 0x11e   :  { %v1116_v10 = vsub.f32 %v2067_v16, %v158_v20  ;;  %1017 = vmatpush1.bf16.msra.mxu0 %v984_v25  ;;  %v1117_v48 = vsub.f32 %v2071_v19, %v158_v20  ;;  %v291_v42 = vsub.f32 %v2054_v8, %v188_v60  ;;  %v292_v44 = vsub.f32 %v2061_v12, %v188_v60 }
 0x11f   :  { %v1694_v35 = vpack.c.bf16 %v1633_v31, %v1631_v54  ;;  %v343_v50 = vand.u32 2147483647, %v279_v59  ;;  %v344_v15 = vand.u32 2147483647, %v280_v52  ;;  %v1128_v14 = vsub.f32 %v2067_v16, %v188_v60 }
 0x120   :  { %v1180_v61 = vand.u32 2147483647, %v1116_v10  ;;  %v1181_v36 = vand.u32 2147483647, %v1117_v48  ;;  %v355_v45 = vand.u32 2147483647, %v291_v42  ;;  %v1129_v2 = vsub.f32 %v2071_v19, %v188_v60 }
 0x121   :  { %1727 = vmatpush1.bf16.msra.mxu1 %v1694_v35  ;;  %v356_v38 = vand.u32 2147483647, %v292_v44  ;;  %v407_v0 = vsub.f32 1.0, %v343_v50  ;;  %v408_v4 = vsub.f32 1.0, %v344_v15  ;;  %v1192_v49 = vand.u32 2147483647, %v1128_v14  ;;  %v203_v35 = vpop.permute.xlu0 %202 }
 0x122   :  { %v1244_v23 = vsub.f32 1.0, %v1180_v61  ;;  %v1245_v9 = vsub.f32 1.0, %v1181_v36  ;;  %v419_v56 = vsub.f32 1.0, %v355_v45  ;;  %v1193_v7 = vand.u32 2147483647, %v1129_v2 }
 0x123   :  { %v420_v18 = vsub.f32 1.0, %v356_v38  ;;  %v2553_v17 = vmax.f32 %v1255_v39, 0.0  ;;  %v2555_v20 = vmax.f32 %v407_v0, 0.0  ;;  %v2557_v30 = vmax.f32 %v408_v4, 0.0 }
 0x124   :  { %v1256_v25 = vsub.f32 1.0, %v1192_v49  ;;  %v2559_v29 = vmax.f32 %v1244_v23, 0.0  ;;  %v2561_v54 = vmax.f32 %v1245_v9, 0.0  ;;  %v2563_v31 = vmax.f32 %v419_v56, 0.0 }
 0x125   :  { %v2565_v59 = vmax.f32 %v420_v18, 0.0  ;;  %v1257_v52 = vsub.f32 1.0, %v1193_v7  ;;  %v674_v10 = vsub.f32 %v2041_v62, %v572_v47  ;;  %v675_v60 = vsub.f32 %v2045_v1, %v572_v47 }
 0x126   :  { %v1383_v39 = vsub.f32 %v2043_v63, %v572_v47  ;;  %v2570_v48 = vmax.f32 %v1256_v25, 0.0  ;;  %v1384_v42 = vsub.f32 %v2052_v5, %v572_v47  ;;  %v297_v44 = vsub.f32 %v2054_v8, %v203_v35 }
 0x127   :  { %v298_v50 = vsub.f32 %v2061_v12, %v203_v35  ;;  %v738_v15 = vand.u32 2147483647, %v674_v10  ;;  %v739_v61 = vand.u32 2147483647, %v675_v60  ;;  %v1134_v36 = vsub.f32 %v2067_v16, %v203_v35 }
 0x128   :  { %3152 = vst [vmem:[#allocation26_spill] sm:$0xff] %v2570_v48  ;;  %v1447_v14 = vand.u32 2147483647, %v1383_v39  ;;  %v1448_v45 = vand.u32 2147483647, %v1384_v42  ;;  %v1135_v0 = vsub.f32 %v2071_v19, %v203_v35  ;;  %v2577_v25 = vmax.f32 %v1257_v52, 0.0 }
 0x129   :  { %v361_v38 = vand.u32 2147483647, %v297_v44  ;;  %v362_v2 = vand.u32 2147483647, %v298_v50  ;;  %v802_v4 = vsub.f32 1.0, %v738_v15  ;;  %v803_v23 = vsub.f32 1.0, %v739_v61  ;;  %v576_v15 = vpop.permute.xlu1 %575 }
 0x12a   :  { %v1511_v49 = vsub.f32 1.0, %v1447_v14  ;;  %v1198_v9 = vand.u32 2147483647, %v1134_v36  ;;  %v1512_v56 = vsub.f32 1.0, %v1448_v45  ;;  %v1199_v47 = vand.u32 2147483647, %v1135_v0 }
 0x12b   :  { %v425_v18 = vsub.f32 1.0, %v361_v38  ;;  %v426_v7 = vsub.f32 1.0, %v362_v2  ;;  %v2579_v10 = vmax.f32 %v802_v4, 0.0  ;;  %v2581_v60 = vmax.f32 %v803_v23, 0.0  ;;  %v3155_v14 = vld [vmem:[#allocation13_spill] sm:$0xff]  ;;  %v3156_v45 = vld [vmem:[#allocation15_spill] sm:$0xff] }
 0x12c   :  { %v1262_v39 = vsub.f32 1.0, %v1198_v9  ;;  %v2583_v42 = vmax.f32 %v1511_v49, 0.0  ;;  %v2585_v44 = vmax.f32 %v1512_v56, 0.0  ;;  %v1263_v61 = vsub.f32 1.0, %v1199_v47  ;;  %v3158_v4 = vld [vmem:[#allocation12_spill] sm:$0xff] }
 0x12d   :  { %v2587_v35 = vmax.f32 %v425_v18, 0.0  ;;  %v2589_v50 = vmax.f32 %v426_v7, 0.0  ;;  %v927_v36 = vmul.f32 %v3155_v14, %v2433_v21  ;;  %v929_v52 = vmul.f32 %v2514_v11, %v2475_v32  ;;  %v3159_v21 = vld [vmem:[#allocation14_spill] sm:$0xff] }
 0x12e   :  { %v1636_v38 = vmul.f32 %v3156_v45, %v2461_v26  ;;  %v2597_v2 = vmax.f32 %v1262_v39, 0.0  ;;  %v1638_v0 = vmul.f32 %v2533_v57, %v2501_v22  ;;  %v926_v23 = vmul.f32 %v3158_v4, %v2431_v34  ;;  %v208_v57 = vpop.permute.xlu0 %207 }
 0x12f   :  { %3153 = vst [vmem:[#allocation33_spill] sm:$0xff] %v2587_v35  ;;  %3154 = vst [vmem:[#allocation40_spill] sm:$0xff] %v2589_v50  ;;  %v928_v49 = vmul.f32 %v2511_v53, %v2471_v58  ;;  %v987_v9 = vpack.c.bf16 %v929_v52, %v927_v36  ;;  %v1635_v56 = vmul.f32 %v3159_v21, %v2435_v28 }
 0x130   :  { %3157 = vst [vmem:[#allocation24_spill] sm:$0xff] %v2597_v2  ;;  %v1637_v32 = vmul.f32 %v2518_v46, %v2481_v3  ;;  %v676_v26 = vsub.f32 %v2041_v62, %v576_v15  ;;  %v1697_v11 = vpack.c.bf16 %v1638_v0, %v1636_v38  ;;  %v677_v7 = vsub.f32 %v2045_v1, %v576_v15 }
 0x131   :  { %v986_v18 = vpack.c.bf16 %v928_v49, %v926_v23  ;;  %v1385_v22 = vsub.f32 %v2043_v63, %v576_v15  ;;  %1018 = vmatprep.subr.bf16.mxu0 %v987_v9  ;;  %v1386_v58 = vsub.f32 %v2052_v5, %v576_v15  ;;  %v299_v53 = vsub.f32 %v2054_v8, %v208_v57 }
 0x132   :  { %v1696_v34 = vpack.c.bf16 %v1637_v32, %v1635_v56  ;;  %v740_v47 = vand.u32 2147483647, %v676_v26  ;;  %1728 = vmatprep.subr.bf16.mxu1 %v1697_v11  ;;  %v741_v28 = vand.u32 2147483647, %v677_v7  ;;  %v300_v46 = vsub.f32 %v2061_v12, %v208_v57  ;;  %v173_v7 = vpop.permute.xlu1 %172 }
 0x133   :  { %1019 = vmatpush1.bf16.msra.mxu0 %v986_v18  ;;  %v1449_v3 = vand.u32 2147483647, %v1385_v22  ;;  %v1136_v39 = vsub.f32 %v2067_v16, %v208_v57  ;;  %v1450_v36 = vand.u32 2147483647, %v1386_v58  ;;  %v363_v52 = vand.u32 2147483647, %v299_v53  ;;  %v223_v18 = vpop.permute.xlu0 %222 }
 0x134   :  { %1729 = vmatpush1.bf16.msra.mxu1 %v1696_v34  ;;  %v804_v14 = vsub.f32 1.0, %v740_v47  ;;  %v1137_v45 = vsub.f32 %v2071_v19, %v208_v57  ;;  %v805_v38 = vsub.f32 1.0, %v741_v28  ;;  %v364_v4 = vand.u32 2147483647, %v300_v46 }
 0x135   :  { %v1513_v0 = vsub.f32 1.0, %v1449_v3  ;;  %v1200_v15 = vand.u32 2147483647, %v1136_v39  ;;  %v2617_v23 = vmax.f32 %v1263_v61, 0.0  ;;  %v1514_v49 = vsub.f32 1.0, %v1450_v36 }
 0x136   :  { %v427_v9 = vsub.f32 1.0, %v363_v52  ;;  %v1201_v21 = vand.u32 2147483647, %v1137_v45  ;;  %v2619_v56 = vmax.f32 %v804_v14, 0.0  ;;  %v2621_v32 = vmax.f32 %v805_v38, 0.0 }
 0x137   :  { %3160 = vst [vmem:[#allocation31_spill] sm:$0xff] %v2617_v23  ;;  %v428_v26 = vsub.f32 1.0, %v364_v4  ;;  %v1264_v11 = vsub.f32 1.0, %v1200_v15  ;;  %v2623_v22 = vmax.f32 %v1513_v0, 0.0  ;;  %v2625_v57 = vmax.f32 %v1514_v49, 0.0 }
 0x138   :  { %v2627_v34 = vmax.f32 %v427_v9, 0.0  ;;  %v305_v61 = vsub.f32 %v2054_v8, %v223_v18  ;;  %v1265_v58 = vsub.f32 1.0, %v1201_v21  ;;  %v306_v53 = vsub.f32 %v2061_v12, %v223_v18 }
 0x139   :  { %v2630_v47 = vmax.f32 %v428_v26, 0.0  ;;  %v1142_v28 = vsub.f32 %v2067_v16, %v223_v18  ;;  %v2634_v3 = vmax.f32 %v1264_v11, 0.0  ;;  %v1143_v39 = vsub.f32 %v2071_v19, %v223_v18 }
 0x13a   :  { %3161 = vst [vmem:[#allocation49_spill] sm:$0xff] %v2627_v34  ;;  %v369_v46 = vand.u32 2147483647, %v305_v61  ;;  %v285_v14 = vsub.f32 %v2054_v8, %v173_v7  ;;  %v370_v36 = vand.u32 2147483647, %v306_v53  ;;  %v286_v45 = vsub.f32 %v2061_v12, %v173_v7  ;;  %v228_v61 = vpop.permute.xlu0 %227 }
 0x13b   :  { %3162 = vst [vmem:[#allocation38_spill] sm:$0xff] %v2630_v47  ;;  %3163 = vst [vmem:[#allocation25_spill] sm:$0xff] %v2634_v3  ;;  %v1206_v52 = vand.u32 2147483647, %v1142_v28  ;;  %v1122_v38 = vsub.f32 %v2067_v16, %v173_v7  ;;  %v1207_v4 = vand.u32 2147483647, %v1143_v39  ;;  %v1123_v49 = vsub.f32 %v2071_v19, %v173_v7  ;;  %v584_v3 = vpop.permute.xlu1 %583 }
 0x13c   :  { %v433_v0 = vsub.f32 1.0, %v369_v46  ;;  %v349_v15 = vand.u32 2147483647, %v285_v14  ;;  %v434_v9 = vsub.f32 1.0, %v370_v36  ;;  %v350_v26 = vand.u32 2147483647, %v286_v45 }
 0x13d   :  { %v1270_v21 = vsub.f32 1.0, %v1206_v52  ;;  %v1186_v11 = vand.u32 2147483647, %v1122_v38  ;;  %v2641_v18 = vmax.f32 %v1265_v58, 0.0  ;;  %v1271_v34 = vsub.f32 1.0, %v1207_v4 }
 0x13e   :  { %v413_v53 = vsub.f32 1.0, %v349_v15  ;;  %v1187_v28 = vand.u32 2147483647, %v1123_v49  ;;  %v2643_v47 = vmax.f32 %v433_v0, 0.0  ;;  %v2645_v2 = vmax.f32 %v434_v9, 0.0 }
 0x13f   :  { %3164 = vst [vmem:[#allocation32_spill] sm:$0xff] %v2641_v18  ;;  %v414_v46 = vsub.f32 1.0, %v350_v26  ;;  %v1250_v39 = vsub.f32 1.0, %v1186_v11  ;;  %v2647_v14 = vmax.f32 %v1270_v21, 0.0  ;;  %v2649_v7 = vmax.f32 %v1271_v34, 0.0 }
 0x140   :  { %3165 = vst [vmem:[#allocation50_spill] sm:$0xff] %v2643_v47  ;;  %3166 = vst [vmem:[#allocation39_spill] sm:$0xff] %v2645_v2  ;;  %v2651_v36 = vmax.f32 %v413_v53, 0.0  ;;  %v307_v52 = vsub.f32 %v2054_v8, %v228_v61  ;;  %v1251_v58 = vsub.f32 1.0, %v1187_v28  ;;  %v308_v38 = vsub.f32 %v2061_v12, %v228_v61  ;;  %v178_v53 = vpop.permute.xlu1 %177 }
 0x141   :  { %3167 = vst [vmem:[#allocation56_spill] sm:$0xff] %v2647_v14  ;;  %3168 = vst [vmem:[#allocation9_spill] sm:$0xff] %v2649_v7  ;;  %v2654_v45 = vmax.f32 %v414_v46, 0.0  ;;  %v1144_v0 = vsub.f32 %v2067_v16, %v228_v61  ;;  %v2658_v4 = vmax.f32 %v1250_v39, 0.0  ;;  %v1145_v49 = vsub.f32 %v2071_v19, %v228_v61 }
 0x142   :  { %v371_v15 = vand.u32 2147483647, %v307_v52  ;;  %v680_v9 = vsub.f32 %v2041_v62, %v584_v3  ;;  %v372_v34 = vand.u32 2147483647, %v308_v38  ;;  %v681_v26 = vsub.f32 %v2045_v1, %v584_v3 }
 0x143   :  { %v1208_v21 = vand.u32 2147483647, %v1144_v0  ;;  %v1389_v11 = vsub.f32 %v2043_v63, %v584_v3  ;;  %v1209_v28 = vand.u32 2147483647, %v1145_v49  ;;  %v1390_v47 = vsub.f32 %v2052_v5, %v584_v3 }
 0x144   :  { %v435_v46 = vsub.f32 1.0, %v371_v15  ;;  %v744_v14 = vand.u32 2147483647, %v680_v9  ;;  %v436_v7 = vsub.f32 1.0, %v372_v34  ;;  %v745_v2 = vand.u32 2147483647, %v681_v26 }
 0x145   :  { %v1272_v39 = vsub.f32 1.0, %v1208_v21  ;;  %v1453_v52 = vand.u32 2147483647, %v1389_v11  ;;  %v2665_v18 = vmax.f32 %v1251_v58, 0.0  ;;  %v1273_v61 = vsub.f32 1.0, %v1209_v28 }
 0x146   :  { %v808_v35 = vsub.f32 1.0, %v744_v14  ;;  %v1454_v38 = vand.u32 2147483647, %v1390_v47  ;;  %v2667_v0 = vmax.f32 %v435_v46, 0.0  ;;  %v2669_v23 = vmax.f32 %v436_v7, 0.0  ;;  %v588_v14 = vpop.permute.xlu1 %587 }
 0x147   :  { %v809_v50 = vsub.f32 1.0, %v745_v2  ;;  %v1517_v48 = vsub.f32 1.0, %v1453_v52  ;;  %v2671_v15 = vmax.f32 %v1272_v39, 0.0  ;;  %v2673_v49 = vmax.f32 %v1273_v61, 0.0 }
 0x148   :  { %v872_v3 = vmax.f32 %v808_v35, 0.0  ;;  %v1518_v9 = vsub.f32 1.0, %v1454_v38  ;;  %v931_v58 = vmul.f32 %v2581_v60, %v2557_v30  ;;  %v933_v47 = vmul.f32 %v2621_v32, %v2465_v37 }
 0x149   :  { %v873_v34 = vmax.f32 %v809_v50, 0.0  ;;  %v1581_v21 = vmax.f32 %v1517_v48, 0.0  ;;  %v1640_v7 = vmul.f32 %v2585_v44, %v2561_v54  ;;  %v1642_v2 = vmul.f32 %v2625_v57, %v2469_v55 }
 0x14a   :  { %v930_v26 = vmul.f32 %v2579_v10, %v2555_v20  ;;  %v932_v35 = vmul.f32 %v2619_v56, %v2463_v24  ;;  %v989_v48 = vpack.c.bf16 %v933_v47, %v931_v58  ;;  %v1639_v30 = vmul.f32 %v2583_v42, %v2559_v29  ;;  %v592_v28 = vpop.permute.xlu1 %591 }
 0x14b   :  { %v1641_v37 = vmul.f32 %v2623_v22, %v2467_v13  ;;  %v287_v60 = vsub.f32 %v2054_v8, %v178_v53  ;;  %v1699_v50 = vpack.c.bf16 %v1642_v2, %v1640_v7  ;;  %v288_v44 = vsub.f32 %v2061_v12, %v178_v53 }
 0x14c   :  { %v988_v54 = vpack.c.bf16 %v932_v35, %v930_v26  ;;  %v1124_v55 = vsub.f32 %v2067_v16, %v178_v53  ;;  %1020 = vmatprep.subr.bf16.mxu0 %v989_v48  ;;  %v1125_v24 = vsub.f32 %v2071_v19, %v178_v53  ;;  %v682_v56 = vsub.f32 %v2041_v62, %v588_v14 }
 0x14d   :  { %v1698_v20 = vpack.c.bf16 %v1641_v37, %v1639_v30  ;;  %v351_v10 = vand.u32 2147483647, %v287_v60  ;;  %1730 = vmatprep.subr.bf16.mxu1 %v1699_v50  ;;  %v352_v29 = vand.u32 2147483647, %v288_v44  ;;  %v683_v13 = vsub.f32 %v2045_v1, %v588_v14 }
 0x14e   :  { %1021 = vmatpush1.bf16.msra.mxu0 %v988_v54  ;;  %v1188_v42 = vand.u32 2147483647, %v1124_v55  ;;  %v1391_v32 = vsub.f32 %v2043_v63, %v588_v14  ;;  %v1189_v57 = vand.u32 2147483647, %v1125_v24  ;;  %v746_v11 = vand.u32 2147483647, %v682_v56 }
 0x14f   :  { %1731 = vmatpush1.bf16.msra.mxu1 %v1698_v20  ;;  %v415_v22 = vsub.f32 1.0, %v351_v10  ;;  %v1392_v46 = vsub.f32 %v2052_v5, %v588_v14  ;;  %v416_v39 = vsub.f32 1.0, %v352_v29  ;;  %v747_v53 = vand.u32 2147483647, %v683_v13  ;;  %v3170_v20 = vld [vmem:[#allocation19_spill] sm:$0xff]  ;;  %v3171_v56 = vld [vmem:[#allocation16_spill] sm:$0xff]  ;;  %v193_v13 = vpop.permute.xlu1 %192 }
 0x150   :  { %v1252_v52 = vsub.f32 1.0, %v1188_v42  ;;  %v1455_v61 = vand.u32 2147483647, %v1391_v32  ;;  %v1582_v38 = vmax.f32 %v1518_v9, 0.0  ;;  %v1253_v58 = vsub.f32 1.0, %v1189_v57  ;;  %v3169_v9 = vld [vmem:[#allocation17_spill] sm:$0xff] }
 0x151   :  { %v810_v47 = vsub.f32 1.0, %v746_v11  ;;  %v1456_v7 = vand.u32 2147483647, %v1392_v46  ;;  %v2699_v2 = vmax.f32 %v415_v22, 0.0  ;;  %v2701_v26 = vmax.f32 %v416_v39, 0.0  ;;  %v3172_v22 = vld [vmem:[#allocation18_spill] sm:$0xff]  ;;  %v243_v46 = vpop.permute.xlu0 %242 }
 0x152   :  { %v811_v35 = vsub.f32 1.0, %v747_v53  ;;  %v1519_v48 = vsub.f32 1.0, %v1455_v61  ;;  %v2703_v30 = vmax.f32 %v1252_v52, 0.0  ;;  %v2705_v37 = vmax.f32 %v1253_v58, 0.0 }
 0x153   :  { %v2707_v14 = vmax.f32 %v810_v47, 0.0  ;;  %v1520_v60 = vsub.f32 1.0, %v1456_v7  ;;  %v935_v44 = vmul.f32 %v3169_v9, %v2505_v27  ;;  %v937_v55 = vmul.f32 %v873_v34, %v2654_v45 }
 0x154   :  { %v2709_v50 = vmax.f32 %v811_v35, 0.0  ;;  %v2711_v54 = vmax.f32 %v1519_v48, 0.0  ;;  %v1644_v10 = vmul.f32 %v3170_v20, %v2509_v43  ;;  %v1646_v24 = vmul.f32 %v1582_v38, %v2665_v18  ;;  %v600_v48 = vpop.permute.xlu1 %599 }
 0x155   :  { %v934_v29 = vmul.f32 %v3171_v56, %v2503_v40  ;;  %v936_v42 = vmul.f32 %v872_v3, %v2651_v36  ;;  %v991_v32 = vpack.c.bf16 %v937_v55, %v935_v44  ;;  %v1643_v57 = vmul.f32 %v3172_v22, %v2507_v6 }
 0x156   :  { %v1645_v11 = vmul.f32 %v1581_v21, %v2658_v4  ;;  %v684_v27 = vsub.f32 %v2041_v62, %v592_v28  ;;  %v1701_v45 = vpack.c.bf16 %v1646_v24, %v1644_v10  ;;  %v685_v43 = vsub.f32 %v2045_v1, %v592_v28 }
 0x157   :  { %v990_v34 = vpack.c.bf16 %v936_v42, %v934_v29  ;;  %v1393_v18 = vsub.f32 %v2043_v63, %v592_v28  ;;  %1022 = vmatprep.subr.bf16.mxu0 %v991_v32  ;;  %v1394_v36 = vsub.f32 %v2052_v5, %v592_v28  ;;  %v313_v3 = vsub.f32 %v2054_v8, %v243_v46 }
 0x158   :  { %v1700_v40 = vpack.c.bf16 %v1645_v11, %v1643_v57  ;;  %v748_v39 = vand.u32 2147483647, %v684_v27  ;;  %1732 = vmatprep.subr.bf16.mxu1 %v1701_v45  ;;  %v749_v6 = vand.u32 2147483647, %v685_v43  ;;  %v314_v21 = vsub.f32 %v2061_v12, %v243_v46 }
 0x159   :  { %1023 = vmatpush1.bf16.msra.mxu0 %v990_v34  ;;  %v1457_v4 = vand.u32 2147483647, %v1393_v18  ;;  %v1150_v52 = vsub.f32 %v2067_v16, %v243_v46  ;;  %v1458_v61 = vand.u32 2147483647, %v1394_v36  ;;  %v377_v38 = vand.u32 2147483647, %v313_v3  ;;  %v248_v34 = vpop.permute.xlu0 %247 }
 0x15a   :  { %1733 = vmatpush1.bf16.msra.mxu1 %v1700_v40  ;;  %v812_v53 = vsub.f32 1.0, %v748_v39  ;;  %v1151_v58 = vsub.f32 %v2071_v19, %v243_v46  ;;  %v813_v47 = vsub.f32 1.0, %v749_v6  ;;  %v378_v35 = vand.u32 2147483647, %v314_v21 }
 0x15b   :  { %v1521_v7 = vsub.f32 1.0, %v1457_v4  ;;  %v1214_v28 = vand.u32 2147483647, %v1150_v52  ;;  %v2733_v9 = vmax.f32 %v1520_v60, 0.0  ;;  %v1522_v44 = vsub.f32 1.0, %v1458_v61  ;;  %v2756_v4 = vpop.permute.xlu1 %197 }
 0x15c   :  { %v441_v55 = vsub.f32 1.0, %v377_v38  ;;  %v1215_v20 = vand.u32 2147483647, %v1151_v58  ;;  %v2735_v10 = vmax.f32 %v812_v53, 0.0  ;;  %v2737_v24 = vmax.f32 %v813_v47, 0.0 }
 0x15d   :  { %v442_v56 = vsub.f32 1.0, %v378_v35  ;;  %v1278_v29 = vsub.f32 1.0, %v1214_v28  ;;  %v2739_v42 = vmax.f32 %v1521_v7, 0.0  ;;  %v2741_v32 = vmax.f32 %v1522_v44, 0.0 }
 0x15e   :  { %v2743_v22 = vmax.f32 %v441_v55, 0.0  ;;  %v293_v57 = vsub.f32 %v2054_v8, %v193_v13  ;;  %v1279_v60 = vsub.f32 1.0, %v1215_v20  ;;  %v294_v27 = vsub.f32 %v2061_v12, %v193_v13 }
 0x15f   :  { %v2746_v11 = vmax.f32 %v442_v56, 0.0  ;;  %v1130_v45 = vsub.f32 %v2067_v16, %v193_v13  ;;  %v2750_v43 = vmax.f32 %v1278_v29, 0.0  ;;  %v1131_v46 = vsub.f32 %v2071_v19, %v193_v13 }
 0x160   :  { %3173 = vst [vmem:[#allocation42_spill] sm:$0xff] %v2743_v22  ;;  %v357_v18 = vand.u32 2147483647, %v293_v57  ;;  %v315_v40 = vsub.f32 %v2054_v8, %v248_v34  ;;  %v358_v39 = vand.u32 2147483647, %v294_v27  ;;  %v316_v3 = vsub.f32 %v2061_v12, %v248_v34  ;;  %v644_v57 = vpop.permute.xlu0 %643 }
 0x161   :  { %3174 = vst [vmem:[#allocation46_spill] sm:$0xff] %v2750_v43  ;;  %v1194_v36 = vand.u32 2147483647, %v1130_v45  ;;  %v1152_v6 = vsub.f32 %v2067_v16, %v248_v34  ;;  %v1195_v52 = vand.u32 2147483647, %v1131_v46  ;;  %v1153_v61 = vsub.f32 %v2071_v19, %v248_v34 }
 0x162   :  { %v421_v21 = vsub.f32 1.0, %v357_v18  ;;  %v379_v53 = vand.u32 2147483647, %v315_v40  ;;  %v422_v38 = vsub.f32 1.0, %v358_v39  ;;  %v380_v47 = vand.u32 2147483647, %v316_v3 }
 0x163   :  { %v1258_v58 = vsub.f32 1.0, %v1194_v36  ;;  %v1216_v7 = vand.u32 2147483647, %v1152_v6  ;;  %v2759_v13 = vmax.f32 %v1279_v60, 0.0  ;;  %v1259_v35 = vsub.f32 1.0, %v1195_v52  ;;  %v2776_v36 = vpop.permute.xlu1 %603 }
 0x164   :  { %v443_v28 = vsub.f32 1.0, %v379_v53  ;;  %v1217_v44 = vand.u32 2147483647, %v1153_v61  ;;  %v2761_v55 = vmax.f32 %v421_v21, 0.0  ;;  %v2763_v20 = vmax.f32 %v422_v38, 0.0 }
 0x165   :  { %3175 = vst [vmem:[#allocation11_spill] sm:$0xff] %v2759_v13  ;;  %v444_v56 = vsub.f32 1.0, %v380_v47  ;;  %v1280_v29 = vsub.f32 1.0, %v1216_v7  ;;  %v2765_v27 = vmax.f32 %v1258_v58, 0.0  ;;  %v2767_v45 = vmax.f32 %v1259_v35, 0.0 }
 0x166   :  { %v2769_v34 = vmax.f32 %v443_v28, 0.0  ;;  %v688_v18 = vsub.f32 %v2041_v62, %v600_v48  ;;  %v1281_v46 = vsub.f32 1.0, %v1217_v44  ;;  %v689_v40 = vsub.f32 %v2045_v1, %v600_v48 }
 0x167   :  { %v2772_v60 = vmax.f32 %v444_v56, 0.0  ;;  %v1397_v39 = vsub.f32 %v2043_v63, %v600_v48  ;;  %v2778_v3 = vmax.f32 %v1280_v29, 0.0  ;;  %v1398_v21 = vsub.f32 %v2052_v5, %v600_v48  ;;  %v2789_v13 = vpop.permute.xlu1 %607 }
 0x168   :  { %3176 = vst [vmem:[#allocation44_spill] sm:$0xff] %v2769_v34  ;;  %v752_v6 = vand.u32 2147483647, %v688_v18  ;;  %v710_v52 = vsub.f32 %v2041_v62, %v644_v57  ;;  %v753_v53 = vand.u32 2147483647, %v689_v40  ;;  %v711_v38 = vsub.f32 %v2045_v1, %v644_v57 }
 0x169   :  { %3177 = vst [vmem:[#allocation48_spill] sm:$0xff] %v2772_v60  ;;  %3178 = vst [vmem:[#allocation55_spill] sm:$0xff] %v2778_v3  ;;  %v1461_v61 = vand.u32 2147483647, %v1397_v39  ;;  %v1419_v58 = vsub.f32 %v2043_v63, %v644_v57  ;;  %v1462_v7 = vand.u32 2147483647, %v1398_v21  ;;  %v1420_v28 = vsub.f32 %v2052_v5, %v644_v57 }
 0x16a   :  { %v816_v47 = vsub.f32 1.0, %v752_v6  ;;  %v774_v35 = vand.u32 2147483647, %v710_v52  ;;  %v817_v44 = vsub.f32 1.0, %v753_v53  ;;  %v775_v29 = vand.u32 2147483647, %v711_v38 }
 0x16b   :  { %v1525_v56 = vsub.f32 1.0, %v1461_v61  ;;  %v1483_v3 = vand.u32 2147483647, %v1419_v58  ;;  %v2785_v18 = vmax.f32 %v1281_v46, 0.0  ;;  %v1526_v48 = vsub.f32 1.0, %v1462_v7 }
 0x16c   :  { %v838_v34 = vsub.f32 1.0, %v774_v35  ;;  %v1484_v60 = vand.u32 2147483647, %v1420_v28  ;;  %v2787_v40 = vmax.f32 %v816_v47, 0.0  ;;  %v881_v39 = vmax.f32 %v817_v44, 0.0 }
 0x16d   :  { %v839_v43 = vsub.f32 1.0, %v775_v29  ;;  %v1547_v22 = vsub.f32 1.0, %v1483_v3  ;;  %v2791_v6 = vmax.f32 %v1525_v56, 0.0  ;;  %v1590_v21 = vmax.f32 %v1526_v48, 0.0 }
 0x16e   :  { %v2793_v57 = vmax.f32 %v838_v34, 0.0  ;;  %v1548_v52 = vsub.f32 1.0, %v1484_v60  ;;  %v939_v61 = vmul.f32 %v2709_v50, %v2701_v26  ;;  %v941_v38 = vmul.f32 %v2737_v24, %v2537_v33 }
 0x16f   :  { %v2795_v53 = vmax.f32 %v839_v43, 0.0  ;;  %v2797_v46 = vmax.f32 %v1547_v22, 0.0  ;;  %v1648_v3 = vmul.f32 %v2733_v9, %v2705_v37  ;;  %v1650_v58 = vmul.f32 %v2741_v32, %v2553_v17 }
 0x170   :  { %v938_v34 = vmul.f32 %v2707_v14, %v2699_v2  ;;  %v940_v43 = vmul.f32 %v2735_v10, %v2535_v41  ;;  %v993_v22 = vpack.c.bf16 %v941_v38, %v939_v61  ;;  %v1647_v60 = vmul.f32 %v2711_v54, %v2703_v30  ;;  %v2825_v54 = vpop.permute.xlu1 %212 }
 0x171   :  { %v1649_v26 = vmul.f32 %v2739_v42, %v2543_v51  ;;  %v295_v33 = vsub.f32 %v2054_v8, %v2756_v4  ;;  %v1703_v37 = vpack.c.bf16 %v1650_v58, %v1648_v3  ;;  %v296_v17 = vsub.f32 %v2061_v12, %v2756_v4 }
 0x172   :  { %v992_v50 = vpack.c.bf16 %v940_v43, %v938_v34  ;;  %v1132_v2 = vsub.f32 %v2067_v16, %v2756_v4  ;;  %1024 = vmatprep.subr.bf16.mxu0 %v993_v22  ;;  %v1133_v30 = vsub.f32 %v2071_v19, %v2756_v4  ;;  %v690_v51 = vsub.f32 %v2041_v62, %v2776_v36 }
 0x173   :  { %v1702_v41 = vpack.c.bf16 %v1649_v26, %v1647_v60  ;;  %v359_v14 = vand.u32 2147483647, %v295_v33  ;;  %1734 = vmatprep.subr.bf16.mxu1 %v1703_v37  ;;  %v360_v9 = vand.u32 2147483647, %v296_v17  ;;  %v691_v24 = vsub.f32 %v2045_v1, %v2776_v36 }
 0x174   :  { %1025 = vmatpush1.bf16.msra.mxu0 %v992_v50  ;;  %v1196_v10 = vand.u32 2147483647, %v1132_v2  ;;  %v1399_v42 = vsub.f32 %v2043_v63, %v2776_v36  ;;  %v1197_v47 = vand.u32 2147483647, %v1133_v30  ;;  %v754_v7 = vand.u32 2147483647, %v690_v51  ;;  %v2845_v33 = vpop.permute.xlu1 %615 }
 0x175   :  { %1735 = vmatpush1.bf16.msra.mxu1 %v1702_v41  ;;  %v423_v32 = vsub.f32 1.0, %v359_v14  ;;  %v1400_v4 = vsub.f32 %v2052_v5, %v2776_v36  ;;  %v424_v35 = vsub.f32 1.0, %v360_v9  ;;  %v755_v44 = vand.u32 2147483647, %v691_v24  ;;  %v3179_v50 = vld [vmem:[#allocation21_spill] sm:$0xff]  ;;  %v3180_v41 = vld [vmem:[#allocation23_spill] sm:$0xff] }
 0x176   :  { %v1260_v28 = vsub.f32 1.0, %v1196_v10  ;;  %v1463_v56 = vand.u32 2147483647, %v1399_v42  ;;  %v2833_v29 = vmax.f32 %v1548_v52, 0.0  ;;  %v1261_v48 = vsub.f32 1.0, %v1197_v47  ;;  %v3181_v51 = vld [vmem:[#allocation20_spill] sm:$0xff] }
 0x177   :  { %v818_v61 = vsub.f32 1.0, %v754_v7  ;;  %v1464_v38 = vand.u32 2147483647, %v1400_v4  ;;  %v2835_v3 = vmax.f32 %v423_v32, 0.0  ;;  %v2837_v58 = vmax.f32 %v424_v35, 0.0  ;;  %v3182_v42 = vld [vmem:[#allocation26_spill] sm:$0xff] }
 0x178   :  { %v819_v34 = vsub.f32 1.0, %v755_v44  ;;  %v1527_v43 = vsub.f32 1.0, %v1463_v56  ;;  %v2839_v22 = vmax.f32 %v1260_v28, 0.0  ;;  %v2841_v60 = vmax.f32 %v1261_v48, 0.0  ;;  %v3183_v32 = vld [vmem:[#allocation22_spill] sm:$0xff]  ;;  %v2877_v28 = vpop.permute.xlu1 %217 }
 0x179   :  { %v2843_v36 = vmax.f32 %v818_v61, 0.0  ;;  %v1528_v26 = vsub.f32 1.0, %v1464_v38  ;;  %v943_v17 = vmul.f32 %v3179_v50, %v2565_v59  ;;  %v945_v2 = vmul.f32 %v881_v39, %v2763_v20 }
 0x17a   :  { %v883_v52 = vmax.f32 %v819_v34, 0.0  ;;  %v2847_v37 = vmax.f32 %v1527_v43, 0.0  ;;  %v1652_v14 = vmul.f32 %v3180_v41, %v2577_v25  ;;  %v1654_v30 = vmul.f32 %v1590_v21, %v2767_v45 }
 0x17b   :  { %v942_v9 = vmul.f32 %v3181_v51, %v2563_v31  ;;  %v944_v10 = vmul.f32 %v2787_v40, %v2761_v55  ;;  %v995_v24 = vpack.c.bf16 %v945_v2, %v943_v17  ;;  %v1651_v47 = vmul.f32 %v3183_v32, %v3182_v42 }
 0x17c   :  { %v1653_v59 = vmul.f32 %v2791_v6, %v2765_v27  ;;  %v692_v20 = vsub.f32 %v2041_v62, %v2789_v13  ;;  %v1705_v39 = vpack.c.bf16 %v1654_v30, %v1652_v14  ;;  %v693_v45 = vsub.f32 %v2045_v1, %v2789_v13 }
 0x17d   :  { %v994_v25 = vpack.c.bf16 %v944_v10, %v942_v9  ;;  %v1401_v31 = vsub.f32 %v2043_v63, %v2789_v13  ;;  %1026 = vmatprep.subr.bf16.mxu0 %v995_v24  ;;  %v1402_v21 = vsub.f32 %v2052_v5, %v2789_v13  ;;  %v301_v27 = vsub.f32 %v2054_v8, %v2825_v54 }
 0x17e   :  { %v1704_v55 = vpack.c.bf16 %v1653_v59, %v1651_v47  ;;  %v756_v40 = vand.u32 2147483647, %v692_v20  ;;  %1736 = vmatprep.subr.bf16.mxu1 %v1705_v39  ;;  %v757_v6 = vand.u32 2147483647, %v693_v45  ;;  %v302_v4 = vsub.f32 %v2061_v12, %v2825_v54  ;;  %v620_v20 = vpop.permute.xlu1 %619 }
 0x17f   :  { %1027 = vmatpush1.bf16.msra.mxu0 %v994_v25  ;;  %v1465_v7 = vand.u32 2147483647, %v1401_v31  ;;  %v1138_v35 = vsub.f32 %v2067_v16, %v2825_v54  ;;  %v1466_v56 = vand.u32 2147483647, %v1402_v21  ;;  %v365_v48 = vand.u32 2147483647, %v301_v27 }
 0x180   :  { %1737 = vmatpush1.bf16.msra.mxu1 %v1704_v55  ;;  %v820_v44 = vsub.f32 1.0, %v756_v40  ;;  %v1139_v13 = vsub.f32 %v2071_v19, %v2825_v54  ;;  %v821_v61 = vsub.f32 1.0, %v757_v6  ;;  %v366_v34 = vand.u32 2147483647, %v302_v4  ;;  %v3184_v27 = vld [vmem:[#allocation40_spill] sm:$0xff] }
 0x181   :  { %v1529_v38 = vsub.f32 1.0, %v1465_v7  ;;  %v1202_v43 = vand.u32 2147483647, %v1138_v35  ;;  %v1592_v50 = vmax.f32 %v1528_v26, 0.0  ;;  %v1530_v17 = vsub.f32 1.0, %v1466_v56 }
 0x182   :  { %v429_v2 = vsub.f32 1.0, %v365_v48  ;;  %v1203_v41 = vand.u32 2147483647, %v1139_v13  ;;  %v884_v14 = vmax.f32 %v820_v44, 0.0  ;;  %v885_v30 = vmax.f32 %v821_v61, 0.0  ;;  %v3185_v44 = vld [vmem:[#allocation31_spill] sm:$0xff] }
 0x183   :  { %v430_v51 = vsub.f32 1.0, %v366_v34  ;;  %v1266_v9 = vsub.f32 1.0, %v1202_v43  ;;  %v1593_v10 = vmax.f32 %v1529_v38, 0.0  ;;  %v1594_v24 = vmax.f32 %v1530_v17, 0.0  ;;  %v3186_v38 = vld [vmem:[#allocation33_spill] sm:$0xff] }
 0x184   :  { %v1267_v42 = vsub.f32 1.0, %v1203_v41  ;;  %v696_v32 = vsub.f32 %v2041_v62, %v2845_v33  ;;  %v2883_v47 = vmax.f32 %v429_v2, 0.0  ;;  %v697_v26 = vsub.f32 %v2045_v1, %v2845_v33 }
 0x185   :  { %v2885_v54 = vmax.f32 %v430_v51, 0.0  ;;  %v1405_v59 = vsub.f32 %v2043_v63, %v2845_v33  ;;  %v2891_v39 = vmax.f32 %v1266_v9, 0.0  ;;  %v1406_v31 = vsub.f32 %v2052_v5, %v2845_v33 }
 0x186   :  { %v2893_v25 = vmax.f32 %v1267_v42, 0.0  ;;  %v760_v45 = vand.u32 2147483647, %v696_v32  ;;  %v761_v55 = vand.u32 2147483647, %v697_v26  ;;  %v947_v21 = vmul.f32 %v883_v52, %v2837_v58 }
 0x187   :  { %v1469_v40 = vand.u32 2147483647, %v1405_v59  ;;  %v949_v6 = vmul.f32 %v885_v30, %v3184_v27  ;;  %v1470_v4 = vand.u32 2147483647, %v1406_v31  ;;  %v1656_v35 = vmul.f32 %v1592_v50, %v2841_v60  ;;  %v3187_v60 = vld [vmem:[#allocation24_spill] sm:$0xff]  ;;  %v2907_v30 = vpop.permute.xlu1 %623 }
 0x188   :  { %v824_v7 = vsub.f32 1.0, %v760_v45  ;;  %v1658_v56 = vmul.f32 %v1594_v24, %v3185_v44  ;;  %v825_v48 = vsub.f32 1.0, %v761_v55  ;;  %v946_v61 = vmul.f32 %v2843_v36, %v2835_v3 }
 0x189   :  { %v997_v13 = vpack.c.bf16 %v949_v6, %v947_v21  ;;  %v948_v34 = vmul.f32 %v884_v14, %v3186_v38  ;;  %v1533_v43 = vsub.f32 1.0, %v1469_v40  ;;  %v1534_v17 = vsub.f32 1.0, %v1470_v4 }
 0x18a   :  { %v888_v33 = vmax.f32 %v824_v7, 0.0  ;;  %v1707_v2 = vpack.c.bf16 %v1658_v56, %v1656_v35  ;;  %v889_v58 = vmax.f32 %v825_v48, 0.0  ;;  %v1655_v41 = vmul.f32 %v2847_v37, %v2839_v22 }
 0x18b   :  { %1028 = vmatprep.subr.bf16.mxu0 %v997_v13  ;;  %v996_v52 = vpack.c.bf16 %v948_v34, %v946_v61  ;;  %v1657_v50 = vmul.f32 %v1593_v10, %v3187_v60  ;;  %v1598_v51 = vmax.f32 %v1534_v17, 0.0  ;;  %v303_v3 = vsub.f32 %v2054_v8, %v2877_v28  ;;  %v233_v44 = vpop.permute.xlu1 %232  ;;  %v3189_v60 = vld [vmem:[#allocation28_spill] sm:$0xff] }
 0x18c   :  { %1738 = vmatprep.subr.bf16.mxu1 %v1707_v2  ;;  %v304_v36 = vsub.f32 %v2061_v12, %v2877_v28  ;;  %v1140_v14 = vsub.f32 %v2067_v16, %v2877_v28  ;;  %v1141_v22 = vsub.f32 %v2071_v19, %v2877_v28  ;;  %v698_v37 = vsub.f32 %v2041_v62, %v620_v20 }
 0x18d   :  { %1029 = vmatpush1.bf16.msra.mxu0 %v996_v52  ;;  %v1706_v9 = vpack.c.bf16 %v1657_v50, %v1655_v41  ;;  %v699_v10 = vsub.f32 %v2045_v1, %v620_v20  ;;  %v367_v24 = vand.u32 2147483647, %v303_v3  ;;  %v1407_v26 = vsub.f32 %v2043_v63, %v620_v20  ;;  %v3188_v41 = vld [vmem:[#allocation38_spill] sm:$0xff]  ;;  %v3190_v3 = vld [vmem:[#allocation32_spill] sm:$0xff] }
 0x18e   :  { %v368_v42 = vand.u32 2147483647, %v304_v36  ;;  %v1204_v32 = vand.u32 2147483647, %v1140_v14  ;;  %v1205_v59 = vand.u32 2147483647, %v1141_v22  ;;  %v1408_v55 = vsub.f32 %v2052_v5, %v620_v20 }
 0x18f   :  { %1739 = vmatpush1.bf16.msra.mxu1 %v1706_v9  ;;  %v762_v45 = vand.u32 2147483647, %v698_v37  ;;  %v763_v31 = vand.u32 2147483647, %v699_v10  ;;  %v431_v40 = vsub.f32 1.0, %v367_v24  ;;  %v1597_v56 = vmax.f32 %v1533_v43, 0.0 }
 0x190   :  { %v432_v21 = vsub.f32 1.0, %v368_v42  ;;  %v1268_v27 = vsub.f32 1.0, %v1204_v32  ;;  %v1471_v6 = vand.u32 2147483647, %v1407_v26  ;;  %v1269_v28 = vsub.f32 1.0, %v1205_v59  ;;  %v3191_v36 = vld [vmem:[#allocation30_spill] sm:$0xff] }
 0x191   :  { %v826_v7 = vsub.f32 1.0, %v762_v45  ;;  %v827_v4 = vsub.f32 1.0, %v763_v31  ;;  %v1472_v35 = vand.u32 2147483647, %v1408_v55  ;;  %v2921_v48 = vmax.f32 %v431_v40, 0.0  ;;  %v3192_v22 = vld [vmem:[#allocation49_spill] sm:$0xff] }
 0x192   :  { %v2923_v13 = vmax.f32 %v432_v21, 0.0  ;;  %v1535_v61 = vsub.f32 1.0, %v1471_v6  ;;  %v2925_v38 = vmax.f32 %v1268_v27, 0.0  ;;  %v2927_v34 = vmax.f32 %v1269_v28, 0.0  ;;  %v3193_v37 = vld [vmem:[#allocation27_spill] sm:$0xff]  ;;  %v3194_v32 = vld [vmem:[#allocation25_spill] sm:$0xff] }
 0x193   :  { %v2929_v20 = vmax.f32 %v826_v7, 0.0  ;;  %v891_v17 = vmax.f32 %v827_v4, 0.0  ;;  %v1536_v2 = vsub.f32 1.0, %v1472_v35  ;;  %v951_v50 = vmul.f32 %v3189_v60, %v3188_v41  ;;  %v3195_v26 = vld [vmem:[#allocation29_spill] sm:$0xff] }
 0x194   :  { %v2931_v52 = vmax.f32 %v1535_v61, 0.0  ;;  %v953_v43 = vmul.f32 %v889_v58, %v2885_v54  ;;  %v1660_v14 = vmul.f32 %v3191_v36, %v3190_v3  ;;  %v1662_v9 = vmul.f32 %v1598_v51, %v2893_v25  ;;  %v632_v51 = vpop.permute.xlu1 %631 }
 0x195   :  { %v950_v10 = vmul.f32 %v3193_v37, %v3192_v22  ;;  %v952_v24 = vmul.f32 %v888_v33, %v2883_v47  ;;  %v1659_v59 = vmul.f32 %v3195_v26, %v3194_v32  ;;  %v1661_v45 = vmul.f32 %v1597_v56, %v2891_v39 }
 0x196   :  { %v999_v42 = vpack.c.bf16 %v953_v43, %v951_v50  ;;  %v700_v31 = vsub.f32 %v2041_v62, %v2907_v30  ;;  %v1709_v54 = vpack.c.bf16 %v1662_v9, %v1660_v14  ;;  %v701_v55 = vsub.f32 %v2045_v1, %v2907_v30 }
 0x197   :  { %v998_v58 = vpack.c.bf16 %v952_v24, %v950_v10  ;;  %v1409_v25 = vsub.f32 %v2043_v63, %v2907_v30  ;;  %v1708_v47 = vpack.c.bf16 %v1661_v45, %v1659_v59  ;;  %v1410_v40 = vsub.f32 %v2052_v5, %v2907_v30 }
 0x198   :  { %1030 = vmatprep.subr.bf16.mxu0 %v999_v42  ;;  %v764_v33 = vand.u32 2147483647, %v700_v31  ;;  %v309_v39 = vsub.f32 %v2054_v8, %v233_v44  ;;  %1740 = vmatprep.subr.bf16.mxu1 %v1709_v54  ;;  %v765_v21 = vand.u32 2147483647, %v701_v55  ;;  %v310_v6 = vsub.f32 %v2061_v12, %v233_v44  ;;  %v238_v10 = vpop.permute.xlu1 %237 }
 0x199   :  { %1031 = vmatpush1.bf16.msra.mxu0 %v998_v58  ;;  %v1473_v27 = vand.u32 2147483647, %v1409_v25  ;;  %v1146_v28 = vsub.f32 %v2067_v16, %v233_v44  ;;  %1741 = vmatpush1.bf16.msra.mxu1 %v1708_v47  ;;  %v1474_v4 = vand.u32 2147483647, %v1410_v40  ;;  %v1147_v56 = vsub.f32 %v2071_v19, %v233_v44  ;;  %v3196_v40 = vld [vmem:[#allocation39_spill] sm:$0xff] }
 0x19a   :  { %v828_v7 = vsub.f32 1.0, %v764_v33  ;;  %v373_v35 = vand.u32 2147483647, %v309_v39  ;;  %v829_v61 = vsub.f32 1.0, %v765_v21  ;;  %v374_v60 = vand.u32 2147483647, %v310_v6 }
 0x19b   :  { %v1537_v41 = vsub.f32 1.0, %v1473_v27  ;;  %v1210_v30 = vand.u32 2147483647, %v1146_v28  ;;  %v1600_v50 = vmax.f32 %v1536_v2, 0.0  ;;  %v1538_v43 = vsub.f32 1.0, %v1474_v4  ;;  %v3197_v28 = vld [vmem:[#allocation9_spill] sm:$0xff] }
 0x19c   :  { %v437_v3 = vsub.f32 1.0, %v373_v35  ;;  %v1211_v36 = vand.u32 2147483647, %v1147_v56  ;;  %v892_v14 = vmax.f32 %v828_v7, 0.0  ;;  %v893_v9 = vmax.f32 %v829_v61, 0.0  ;;  %v3198_v61 = vld [vmem:[#allocation50_spill] sm:$0xff] }
 0x19d   :  { %v438_v22 = vsub.f32 1.0, %v374_v60  ;;  %v1274_v37 = vsub.f32 1.0, %v1210_v30  ;;  %v1601_v24 = vmax.f32 %v1537_v41, 0.0  ;;  %v1602_v42 = vmax.f32 %v1538_v43, 0.0 }
 0x19e   :  { %v1275_v32 = vsub.f32 1.0, %v1211_v36  ;;  %v704_v26 = vsub.f32 %v2041_v62, %v632_v51  ;;  %v2958_v59 = vmax.f32 %v437_v3, 0.0  ;;  %v705_v45 = vsub.f32 %v2045_v1, %v632_v51 }
 0x19f   :  { %v2960_v44 = vmax.f32 %v438_v22, 0.0  ;;  %v1413_v2 = vsub.f32 %v2043_v63, %v632_v51  ;;  %v2964_v31 = vmax.f32 %v1274_v37, 0.0  ;;  %v1414_v55 = vsub.f32 %v2052_v5, %v632_v51  ;;  %v636_v51 = vpop.permute.xlu1 %635 }
 0x1a0   :  { %v2966_v54 = vmax.f32 %v1275_v32, 0.0  ;;  %v768_v58 = vand.u32 2147483647, %v704_v26  ;;  %v769_v25 = vand.u32 2147483647, %v705_v45  ;;  %v955_v33 = vmul.f32 %v891_v17, %v2923_v13 }
 0x1a1   :  { %v1477_v47 = vand.u32 2147483647, %v1413_v2  ;;  %v957_v39 = vmul.f32 %v893_v9, %v3196_v40  ;;  %v1478_v27 = vand.u32 2147483647, %v1414_v55  ;;  %v1664_v6 = vmul.f32 %v1600_v50, %v2927_v34  ;;  %v3199_v50 = vld [vmem:[#allocation56_spill] sm:$0xff] }
 0x1a2   :  { %v832_v21 = vsub.f32 1.0, %v768_v58  ;;  %v1666_v7 = vmul.f32 %v1602_v42, %v3197_v28  ;;  %v833_v4 = vsub.f32 1.0, %v769_v25  ;;  %v954_v56 = vmul.f32 %v2929_v20, %v2921_v48 }
 0x1a3   :  { %v1001_v35 = vpack.c.bf16 %v957_v39, %v955_v33  ;;  %v956_v41 = vmul.f32 %v892_v14, %v3198_v61  ;;  %v1541_v30 = vsub.f32 1.0, %v1477_v47  ;;  %v1542_v43 = vsub.f32 1.0, %v1478_v27  ;;  %v640_v25 = vpop.permute.xlu1 %639 }
 0x1a4   :  { %v896_v60 = vmax.f32 %v832_v21, 0.0  ;;  %v1711_v13 = vpack.c.bf16 %v1666_v7, %v1664_v6  ;;  %v897_v17 = vmax.f32 %v833_v4, 0.0  ;;  %v1663_v34 = vmul.f32 %v2931_v52, %v2925_v38 }
 0x1a5   :  { %1032 = vmatprep.subr.bf16.mxu0 %v1001_v35  ;;  %v1000_v3 = vpack.c.bf16 %v956_v41, %v954_v56  ;;  %v1665_v36 = vmul.f32 %v1601_v24, %v3199_v50  ;;  %v1606_v9 = vmax.f32 %v1542_v43, 0.0  ;;  %v311_v22 = vsub.f32 %v2054_v8, %v238_v10  ;;  %v3201_v50 = vld [vmem:[#allocation37_spill] sm:$0xff] }
 0x1a6   :  { %1742 = vmatprep.subr.bf16.mxu1 %v1711_v13  ;;  %v312_v48 = vsub.f32 %v2061_v12, %v238_v10  ;;  %v1148_v20 = vsub.f32 %v2067_v16, %v238_v10  ;;  %v1149_v37 = vsub.f32 %v2071_v19, %v238_v10  ;;  %v706_v42 = vsub.f32 %v2041_v62, %v636_v51 }
 0x1a7   :  { %1033 = vmatpush1.bf16.msra.mxu0 %v1000_v3  ;;  %v1710_v14 = vpack.c.bf16 %v1665_v36, %v1663_v34  ;;  %v707_v32 = vsub.f32 %v2045_v1, %v636_v51  ;;  %v375_v26 = vand.u32 2147483647, %v311_v22  ;;  %v1415_v24 = vsub.f32 %v2043_v63, %v636_v51  ;;  %v3200_v3 = vld [vmem:[#allocation35_spill] sm:$0xff] }
 0x1a8   :  { %v376_v38 = vand.u32 2147483647, %v312_v48  ;;  %v1212_v52 = vand.u32 2147483647, %v1148_v20  ;;  %v1213_v45 = vand.u32 2147483647, %v1149_v37  ;;  %v1416_v55 = vsub.f32 %v2052_v5, %v636_v51  ;;  %v253_v37 = vpop.permute.xlu1 %252 }
 0x1a9   :  { %1743 = vmatpush1.bf16.msra.mxu1 %v1710_v14  ;;  %v770_v2 = vand.u32 2147483647, %v706_v42  ;;  %v771_v58 = vand.u32 2147483647, %v707_v32  ;;  %v439_v47 = vsub.f32 1.0, %v375_v26  ;;  %v1605_v28 = vmax.f32 %v1541_v30, 0.0 }
 0x1aa   :  { %v440_v33 = vsub.f32 1.0, %v376_v38  ;;  %v1276_v40 = vsub.f32 1.0, %v1212_v52  ;;  %v1479_v10 = vand.u32 2147483647, %v1415_v24  ;;  %v1277_v39 = vsub.f32 1.0, %v1213_v45  ;;  %v3202_v48 = vld [vmem:[#allocation34_spill] sm:$0xff] }
 0x1ab   :  { %v834_v21 = vsub.f32 1.0, %v770_v2  ;;  %v835_v27 = vsub.f32 1.0, %v771_v58  ;;  %v1480_v6 = vand.u32 2147483647, %v1416_v55  ;;  %v2987_v7 = vmax.f32 %v439_v47, 0.0  ;;  %v3203_v32 = vld [vmem:[#allocation36_spill] sm:$0xff] }
 0x1ac   :  { %v2989_v4 = vmax.f32 %v440_v33, 0.0  ;;  %v1543_v35 = vsub.f32 1.0, %v1479_v10  ;;  %v2991_v56 = vmax.f32 %v1276_v40, 0.0  ;;  %v2993_v61 = vmax.f32 %v1277_v39, 0.0  ;;  %v648_v10 = vpop.permute.xlu1 %647 }
 0x1ad   :  { %v2995_v41 = vmax.f32 %v834_v21, 0.0  ;;  %v899_v51 = vmax.f32 %v835_v27, 0.0  ;;  %v1544_v43 = vsub.f32 1.0, %v1480_v6  ;;  %v959_v34 = vmul.f32 %v3200_v3, %v2669_v23 }
 0x1ae   :  { %v2997_v13 = vmax.f32 %v1543_v35, 0.0  ;;  %v961_v30 = vmul.f32 %v897_v17, %v2960_v44  ;;  %v1668_v36 = vmul.f32 %v3201_v50, %v2673_v49  ;;  %v1670_v22 = vmul.f32 %v1606_v9, %v2966_v54 }
 0x1af   :  { %v958_v20 = vmul.f32 %v3202_v48, %v2667_v0  ;;  %v960_v14 = vmul.f32 %v896_v60, %v2958_v59  ;;  %v1667_v26 = vmul.f32 %v3203_v32, %v2671_v15  ;;  %v1669_v38 = vmul.f32 %v1605_v28, %v2964_v31 }
 0x1b0   :  { %v1003_v42 = vpack.c.bf16 %v961_v30, %v959_v34  ;;  %v708_v23 = vsub.f32 %v2041_v62, %v640_v25  ;;  %v1713_v44 = vpack.c.bf16 %v1670_v22, %v1668_v36  ;;  %v709_v49 = vsub.f32 %v2045_v1, %v640_v25 }
 0x1b1   :  { %v1002_v17 = vpack.c.bf16 %v960_v14, %v958_v20  ;;  %v1417_v54 = vsub.f32 %v2043_v63, %v640_v25  ;;  %v1712_v9 = vpack.c.bf16 %v1669_v38, %v1667_v26  ;;  %v1418_v59 = vsub.f32 %v2052_v5, %v640_v25 }
 0x1b2   :  { %1034 = vmatprep.subr.bf16.mxu0 %v1003_v42  ;;  %v772_v0 = vand.u32 2147483647, %v708_v23  ;;  %v317_v60 = vsub.f32 %v2054_v8, %v253_v37  ;;  %1744 = vmatprep.subr.bf16.mxu1 %v1713_v44  ;;  %v773_v15 = vand.u32 2147483647, %v709_v49  ;;  %v318_v31 = vsub.f32 %v2061_v12, %v253_v37  ;;  %v3204_v23 = vld [vmem:[#allocation11_spill] sm:$0xff] }
 0x1b3   :  { %1035 = vmatpush1.bf16.msra.mxu0 %v1002_v17  ;;  %v1481_v52 = vand.u32 2147483647, %v1417_v54  ;;  %v1154_v24 = vsub.f32 %v2067_v16, %v253_v37  ;;  %1745 = vmatpush1.bf16.msra.mxu1 %v1712_v9  ;;  %v1482_v2 = vand.u32 2147483647, %v1418_v59  ;;  %v1155_v55 = vsub.f32 %v2071_v19, %v253_v37  ;;  %v3205_v54 = vld [vmem:[#allocation42_spill] sm:$0xff] }
 0x1b4   :  { %v836_v45 = vsub.f32 1.0, %v772_v0  ;;  %v381_v58 = vand.u32 2147483647, %v317_v60  ;;  %v837_v47 = vsub.f32 1.0, %v773_v15  ;;  %v382_v40 = vand.u32 2147483647, %v318_v31 }
 0x1b5   :  { %v1545_v33 = vsub.f32 1.0, %v1481_v52  ;;  %v1218_v25 = vand.u32 2147483647, %v1154_v24  ;;  %v1608_v8 = vmax.f32 %v1544_v43, 0.0  ;;  %v1546_v39 = vsub.f32 1.0, %v1482_v2  ;;  %v3206_v60 = vld [vmem:[#allocation46_spill] sm:$0xff] }
 0x1b6   :  { %v445_v21 = vsub.f32 1.0, %v381_v58  ;;  %v1219_v27 = vand.u32 2147483647, %v1155_v55  ;;  %v900_v6 = vmax.f32 %v836_v45, 0.0  ;;  %v901_v28 = vmax.f32 %v837_v47, 0.0  ;;  %v3207_v31 = vld [vmem:[#allocation48_spill] sm:$0xff] }
 0x1b7   :  { %v446_v12 = vsub.f32 1.0, %v382_v40  ;;  %v1282_v35 = vsub.f32 1.0, %v1218_v25  ;;  %v1609_v16 = vmax.f32 %v1545_v33, 0.0  ;;  %v1610_v3 = vmax.f32 %v1546_v39, 0.0  ;;  %v3208_v58 = vld [vmem:[#allocation44_spill] sm:$0xff]  ;;  %v3209_v40 = vld [vmem:[#allocation55_spill] sm:$0xff] }
 0x1b8   :  { %v509_v34 = vmax.f32 %v445_v21, 0.0  ;;  %v712_v30 = vsub.f32 %v2041_v62, %v648_v10  ;;  %v1283_v19 = vsub.f32 1.0, %v1219_v27  ;;  %v713_v36 = vsub.f32 %v2045_v1, %v648_v10 }
 0x1b9   :  { %v510_v50 = vmax.f32 %v446_v12, 0.0  ;;  %v1421_v22 = vsub.f32 %v2043_v63, %v648_v10  ;;  %v1346_v48 = vmax.f32 %v1282_v35, 0.0  ;;  %v1422_v20 = vsub.f32 %v2052_v5, %v648_v10 }
 0x1ba   :  { %v776_v43 = vand.u32 2147483647, %v712_v30  ;;  %v963_v14 = vmul.f32 %v899_v51, %v2989_v4  ;;  %v777_v37 = vand.u32 2147483647, %v713_v36  ;;  %v965_v32 = vmul.f32 %v901_v28, %v2746_v11 }
 0x1bb   :  { %v1485_v42 = vand.u32 2147483647, %v1421_v22  ;;  %v1672_v26 = vmul.f32 %v1608_v8, %v2993_v61  ;;  %v1486_v62 = vand.u32 2147483647, %v1422_v20  ;;  %v1674_v44 = vmul.f32 %v1610_v3, %v3204_v23 }
 0x1bc   :  { %v840_v38 = vsub.f32 1.0, %v776_v43  ;;  %v962_v1 = vmul.f32 %v2995_v41, %v2987_v7  ;;  %v841_v63 = vsub.f32 1.0, %v777_v37  ;;  %v1005_v49 = vpack.c.bf16 %v965_v32, %v963_v14  ;;  %v970_v7 = vld [vmem:[%s3062_s3] sm:$0xff] }
 0x1bd   :  { %v1549_v17 = vsub.f32 1.0, %v1485_v42  ;;  %v964_v5 = vmul.f32 %v900_v6, %v3205_v54  ;;  %v1550_v4 = vsub.f32 1.0, %v1486_v62  ;;  %v1715_v51 = vpack.c.bf16 %v1674_v44, %v1672_v26 }
 0x1be   :  { %v904_v9 = vmax.f32 %v840_v38, 0.0  ;;  %v1671_v11 = vmul.f32 %v2997_v13, %v2991_v56  ;;  %v905_v0 = vmax.f32 %v841_v63, 0.0  ;;  %1036 = vmatprep.subr.bf16.mxu0 %v1005_v49  ;;  %v1673_v15 = vmul.f32 %v1609_v16, %v3206_v60  ;;  %v1793_v56 = vld [vmem:[%s3062_s3 + $0x8] sm:$0xff]  ;;  %s1877_s3 = smov [#allocation4]  }
 0x1bf   :  { %v1613_v61 = vmax.f32 %v1549_v17, 0.0  ;;  %v1004_v59 = vpack.c.bf16 %v964_v5, %v962_v1  ;;  %v1347_v41 = vmax.f32 %v1283_v19, 0.0  ;;  %v1614_v52 = vmax.f32 %v1550_v4, 0.0  ;;  %1746 = vmatprep.subr.bf16.mxu1 %v1715_v51  ;;  %s1770_s21 = sshll.u32 %s1877_s3, 4  ;;  %s1771_s21 = int_to_ptr.vmem [resolvable:$true] %s1770_s21 }
 0x1c0   :  { %v967_v24 = vmul.f32 %v2795_v53, %v3207_v31  ;;  %v1676_v45 = vmul.f32 %v2833_v29, %v2785_v18  ;;  %v1714_v13 = vpack.c.bf16 %v1673_v15, %v1671_v11  ;;  %v969_v2 = vmul.f32 %v905_v0, %v510_v50  ;;  %s1848_s22 = scalar_lea.vmem %s1771_s21, 256  ;;  %p1853_p6 = scmp.lt.s32.totalorder %s1771_s21, %s1771_s21 }
 0x1c1   :  { %1037 = vmatpush1.bf16.msra.mxu0 %v1004_v59  ;;  %v966_v55 = vmul.f32 %v2793_v57, %v3208_v58  ;;  %v968_v47 = vmul.f32 %v904_v9, %v509_v34  ;;  %v1678_v33 = vmul.f32 %v1614_v52, %v1347_v41  ;;  %v1675_v25 = vmul.f32 %v2797_v46, %v3209_v40  ;;  %p1849_p5 = scmp.ne.s32.totalorder %s1771_s21, %s1848_s22  ;;  %p1854_p7 = scmp.lt.s32.totalorder %s1848_s22, %s1848_s22 }
 0x1c2   :  { %v1677_v10 = vmul.f32 %v1613_v61, %v1346_v48  ;;  %v972_v53 = vcombine.high %v970_v7, %v970_v7  ;;  %1747 = vmatpush1.bf16.msra.mxu1 %v1714_v13  ;;  %v1007_v8 = vpack.c.bf16 %v969_v2, %v967_v24  ;;  %v1682_v29 = vcombine.high %v1793_v56, %v1793_v56 }
 0x1c3   :  { %v1006_v18 = vpack.c.bf16 %v968_v47, %v966_v55  ;;  %v1717_v39 = vpack.c.bf16 %v1678_v33, %v1676_v45  ;;  %v974_v6 = vpack.c.bf16 %v970_v7, %v970_v7  ;;  %v1684_v57 = vpack.c.bf16 %v1793_v56, %v1793_v56  ;;  %p1855_p8 = por %p1854_p7, %p1853_p6 }
 0x1c4   :  { %v1716_v21 = vpack.c.bf16 %v1677_v10, %v1675_v25  ;;  %v975_v27 = vpack.c.bf16 %v972_v53, %v972_v53  ;;  %1038 = vmatprep.subr.bf16.mxu0 %v1007_v8  ;;  %v1685_v28 = vpack.c.bf16 %v1682_v29, %v1682_v29 }
 0x1c5   :  { %1748 = vmatprep.subr.bf16.mxu1 %v1717_v39  ;;  %1039 = vmatpush1.bf16.msra.mxu0 %v1006_v18  ;;  %p1856_p9 = pnand %p1855_p8, %p1849_p5 }
 0x1c6   :  { %1749 = vmatpush1.bf16.msra.mxu1 %v1716_v21  ;;  %1040 = vmatprep.mubr.bf16.mxu0 %v975_v27 }
 0x1c7   :  { %1750 = vmatprep.mubr.bf16.mxu1 %v1685_v28 }
 0x1c8   :  { %1041 = vmatmul.mubr.bf16.vlgmr.msra.gmra.mrb[0].mxu0 %v974_v6 }
 0x1c9   :  { %1751 = vmatmul.mubr.bf16.vlgmr.msra.gmra.mrb[0].mxu1 %v1684_v57 }
 0x29b   :  { %v1042_v46 = vpop.f32.mrb[0].mxu0 }
 0x29c   :  { %v1752_v12 = vpop.f32.mrb[0].mxu1  ;;  %v1044_v35 = vpop.f32.mrb[1].mxu0 }
 0x29d   :  { %v1051_v16 = vcombine.low %v1042_v46, %v1044_v35  ;;  %v1754_v3 = vpop.f32.mrb[1].mxu1  ;;  %v1046_v34 = vpop.f32.mrb[2].mxu0 }
 0x29e   :  { %v1761_v30 = vcombine.low %v1752_v12, %v1754_v3  ;;  %v1756_v50 = vpop.f32.mrb[2].mxu1  ;;  %v1047_v19 = vpop.f32.mrb[3].mxu0 }
 0x29f   :  { %1053 = vst [vmem:[#allocation4] sm:$0xff] %v1051_v16  ;;  %v1757_v36 = vpop.f32.mrb[3].mxu1 }
 0x2a0   :  { %1764 = vst [vmem:[#allocation4 + $0x8] sm:$0xff] %v1761_v30 }
 0x2a1   :  { %1859 = shalt.err (!%p1856_p9)
}
 0x2a2   :  { %s1860_s24 = scalar_lea.hbm %s3063_s4, 256 }
 0x2a3   :  { %p1861_p10 = scmp.ne.s32.totalorder %s3063_s4, %s1860_s24  ;;  %p1864_p11 = scmp.lt.u32.totalorder %s1860_s24, %s3063_s4 }
 0x2a5   :  { %p1866_p12 = pnand %p1864_p11, %p1861_p10 }
 0x2a7   :  { %1869 = shalt.err (!%p1866_p12)
}
 0x2a8   :  { %s1878_s29 = smov 128   ;;  %s1879_s30 = smov 8  }
 0x2a9   :  { %1776 = dma.vmem_to_hbm [thread:$0]  %s1771_s21, 256, %s3063_s4, [#allocation5], %s1878_s29, %s1878_s29, %s1879_s30  }
 0x2aa   :  { %1872 = dma.done.wait [#allocation5], 256  }
 0x2ab   :  { %1873 = vsyncadd [#allocation5], 4294967040 }
 0x2ac   :  { %1780 = vsyncpa [#allocation5], 1 }

</bundles_post_ra>
